<compile_context>
chip_gen: v7x
topology: tpu7x:2x2x1
jax: 0.10.0
libtpu: 0.0.40
codegen_flags: <defaults>
</compile_context>

<pallas_src>
import jax
import jax.numpy as jnp
from jax.experimental import pallas as pl
from jax.experimental.pallas import tpu as pltpu


def _round_up(x, m):
    return (x + m - 1) // m * m


def _mlp_log_softmax_kernel(x_ref, w1_ref, b1_ref, w2_ref, b2_ref, o_ref):
    """One row-tile of:  log_softmax(relu(x @ W1 + b1) @ W2 + b2, axis=-1)."""
    # Linear 1 + ReLU.  x tile cast to the weight compute dtype (bf16 by
    # default) -> single-pass MXU with f32 accumulation.
    x = x_ref[...].astype(w1_ref.dtype)
    h = jnp.dot(x, w1_ref[...], preferred_element_type=jnp.float32)
    h = jnp.maximum(h + b1_ref[...], 0.0)
    # TODO(synk): Dropout(p=0) is identity -> no dropout mask generated.
    # Linear 2: h (f32) x W2 (f32, resident).  HIGHEST precision so the f32
    # MXU decomposition matches the f32 reference math.
    logits = jnp.dot(h, w2_ref[...], preferred_element_type=jnp.float32,
                     precision=jax.lax.Precision.HIGHEST) + b2_ref[...]
    # Numerically stable log-softmax along the feature axis, all in f32.
    m = jnp.max(logits, axis=-1, keepdims=True)
    s = logits - m
    lse = jnp.log(jnp.sum(jnp.exp(s), axis=-1, keepdims=True))
    o_ref[...] = (s - lse).astype(o_ref.dtype)


def mlp_log_softmax(x, w1, b1, w2, b2, *, tile_rows=512,
                    compute_dtype=jnp.bfloat16):
    """x: (B,S,D_in); w1: (D_in,E) == W1^T; b1: (E,); w2: (E,D_out) == W2^T; b2: (D_out,)."""
    B, S, D_in = x.shape
    E = w1.shape[1]
    D_out = w2.shape[1]
    rows = B * S
    out_dtype = x.dtype

    # x streamed at native dtype (kernel casts per-tile); W1 pre-cast to the
    # compute dtype (tiny, resident); W2 / biases stay f32 (f32 softmax math).
    x2 = x.reshape(rows, D_in)
    w1c = w1.astype(compute_dtype)
    w2c = w2.astype(jnp.float32)
    b1_2 = b1.reshape(1, E).astype(jnp.float32)
    b2_2 = b2.reshape(1, D_out).astype(jnp.float32)

    # Row tile: multiple of 16 (covers bf16 sublane packing), capped to the
    # (padded) row count, and split so the grid has >= 2 steps when possible
    # (lets megacore shard the "parallel" row axis).
    row_align = 16
    tr = min(max(tile_rows, row_align), _round_up(rows, row_align))
    tr = max(row_align, (tr // row_align) * row_align)
    if _round_up(rows, tr) // tr < 2 and tr >= 2 * row_align:
        tr = _round_up(tr // 2, row_align)
    rows_p = _round_up(rows, tr)
    grid = rows_p // tr

    xp = x2 if rows_p == rows else jnp.pad(x2, ((0, rows_p - rows), (0, 0)))

    # Grid-invariant operands: resident full-array VMEM refs (fetched once).
    resident = pl.BlockSpec(memory_space=pltpu.MemorySpace.VMEM)

    # Explicit VMEM budget: double-buffered x/out tiles + resident weights +
    # f32 intermediates, with 4x headroom; capped below v7x's 64 MiB per TC.
    x_isize = jnp.dtype(xp.dtype).itemsize
    o_isize = jnp.dtype(out_dtype).itemsize
    vmem_est = (2 * tr * D_in * x_isize
                + 2 * tr * D_out * o_isize
                + D_in * E * jnp.dtype(compute_dtype).itemsize
                + (E * D_out + E + D_out) * 4
                + tr * (E + D_out) * 4)
    vmem_limit = int(min(max(4 * vmem_est, 16 << 20), 48 << 20))

    out = pl.pallas_call(
        _mlp_log_softmax_kernel,
        out_shape=jax.ShapeDtypeStruct((rows_p, D_out), out_dtype),
        grid_spec=pltpu.PrefetchScalarGridSpec(
            num_scalar_prefetch=0,
            grid=(grid,),
            in_specs=[
                pl.BlockSpec((tr, D_in), lambda i: (i, 0)),   # streamed rows of x
                resident,                                     # W1 (bf16)
                resident,                                     # b1 (f32)
                resident,                                     # W2 (f32)
                resident,                                     # b2 (f32)
            ],
            out_specs=pl.BlockSpec((tr, D_out), lambda i: (i, 0)),
        ),
        compiler_params=pltpu.CompilerParams(
            dimension_semantics=("parallel",),
            vmem_limit_bytes=vmem_limit,
        ),
    )(xp, w1c, b1_2, w2c, b2_2)

    return out[:rows].reshape(B, S, D_out)


def _xavier_uniform(key, fan_in, fan_out, gain):
    # torch.nn.init.xavier_uniform_ with gain = calculate_gain('relu') = sqrt(2)
    bound = gain * jnp.sqrt(6.0 / (fan_in + fan_out))
    return jax.random.uniform(key, (fan_in, fan_out), jnp.float32, -bound, bound)


if __name__ == "__main__":
    # Small shapes consistent with MLP_Log_Softmax(input_size, embedding_size, output_size),
    # sized so the row grid has >= 2 tiles.
    B, S = 2, 256
    input_size, embedding_size, output_size = 64, 64, 16

    key = jax.random.PRNGKey(0)
    kx, kw1, kb1, kw2, kb2 = jax.random.split(key, 5)

    gain = jnp.sqrt(2.0)  # nn.init.calculate_gain('relu')
    x = jax.random.normal(kx, (B, S, input_size), jnp.float32)
    w1 = _xavier_uniform(kw1, input_size, embedding_size, gain)       # (D_in, E)  == W1^T
    w2 = _xavier_uniform(kw2, embedding_size, output_size, gain)      # (E, D_out) == W2^T
    # PyTorch Linear default bias init: U(-1/sqrt(fan_in), 1/sqrt(fan_in))
    b1 = jax.random.uniform(kb1, (embedding_size,), jnp.float32,
                            -1.0 / jnp.sqrt(input_size), 1.0 / jnp.sqrt(input_size))
    b2 = jax.random.uniform(kb2, (output_size,), jnp.float32,
                            -1.0 / jnp.sqrt(embedding_size), 1.0 / jnp.sqrt(embedding_size))

    y = mlp_log_softmax(x, w1, b1, w2, b2)
    y = jax.block_until_ready(y)
    assert y.shape == (B, S, output_size)

    # Reference with the SAME bf16 quantization of x/W1 used in the kernel's
    # first matmul (second matmul, biases and log-softmax stay f32).
    xq = x.astype(jnp.bfloat16).astype(jnp.float32).reshape(-1, input_size)
    w1q = w1.astype(jnp.bfloat16).astype(jnp.float32)
    h_ref = jnp.maximum(jnp.dot(xq, w1q, precision="highest") + b1, 0.0)
    logits_ref = jnp.dot(h_ref, w2, precision="highest") + b2
    y_ref = jax.nn.log_softmax(logits_ref, axis=-1).reshape(B, S, output_size)

    err = float(jnp.max(jnp.abs(y.astype(jnp.float32) - y_ref)))
    assert jnp.allclose(y.astype(jnp.float32), y_ref, atol=2e-4, rtol=2e-4), err
    # log-softmax sanity: rows exponentiate to a proper distribution.
    assert jnp.allclose(jnp.sum(jnp.exp(y.astype(jnp.float32)), axis=-1), 1.0, atol=1e-4)

    print("KERNEL_OK")
</pallas_src>

<mosaic_0001>
module attributes {stable_mosaic.version = 11 : i64} {
  func.func @_mlp_log_softmax_kernel(%arg0: i32, %arg1: memref<256x64xf32, #tpu.memory_space<vmem>>, %arg2: memref<64x64xbf16, #tpu.memory_space<vmem>>, %arg3: memref<1x64xf32, #tpu.memory_space<vmem>>, %arg4: memref<64x16xf32, #tpu.memory_space<vmem>>, %arg5: memref<1x16xf32, #tpu.memory_space<vmem>>, %arg6: memref<256x16xf32, #tpu.memory_space<vmem>>) attributes {dimension_semantics = [#tpu.dimension_semantics<parallel>], iteration_bounds = array<i64: 2>, scalar_prefetch = 0 : i64, scratch_operands = 0 : i64, tpu.core_type = #tpu.core_type<tc>, window_params = [{transform_indices = @transform_0, window_bounds = array<i64: 256, 64>}, {pipeline_mode = #tpu.pipeline_mode<synchronous>, transform_indices = @transform_1, window_bounds = array<i64: 64, 64>}, {pipeline_mode = #tpu.pipeline_mode<synchronous>, transform_indices = @transform_2, window_bounds = array<i64: 1, 64>}, {pipeline_mode = #tpu.pipeline_mode<synchronous>, transform_indices = @transform_3, window_bounds = array<i64: 64, 16>}, {pipeline_mode = #tpu.pipeline_mode<synchronous>, transform_indices = @transform_4, window_bounds = array<i64: 1, 16>}, {transform_indices = @transform_5, window_bounds = array<i64: 256, 16>}]} {
    %c0 = arith.constant 0 : index
    %c0_0 = arith.constant 0 : index
    %0 = vector.load %arg1[%c0, %c0_0] : memref<256x64xf32, #tpu.memory_space<vmem>>, vector<256x64xf32>
    %1 = arith.truncf %0 : vector<256x64xf32> to vector<256x64xbf16>
    %c0_1 = arith.constant 0 : index
    %c0_2 = arith.constant 0 : index
    %2 = vector.load %arg2[%c0_1, %c0_2] : memref<64x64xbf16, #tpu.memory_space<vmem>>, vector<64x64xbf16>
    %cst = arith.constant dense<0.000000e+00> : vector<256x64xf32>
    %3 = tpu.matmul %1, %2, %cst {dimension_numbers = #tpu.dot_dimension_numbers<[1], [0], [0], [1], [0, 0, 1, 1], [], []>} : vector<256x64xbf16>, vector<64x64xbf16>, vector<256x64xf32> -> vector<256x64xf32>
    %c0_3 = arith.constant 0 : index
    %c0_4 = arith.constant 0 : index
    %4 = vector.load %arg3[%c0_3, %c0_4] : memref<1x64xf32, #tpu.memory_space<vmem>>, vector<1x64xf32>
    %5 = vector.broadcast %4 : vector<1x64xf32> to vector<256x64xf32>
    %6 = arith.addf %3, %5 : vector<256x64xf32>
    %cst_5 = arith.constant 0.000000e+00 : f32
    %7 = vector.broadcast %cst_5 : f32 to vector<256x64xf32>
    %8 = arith.maximumf %6, %7 : vector<256x64xf32>
    %c0_6 = arith.constant 0 : index
    %c0_7 = arith.constant 0 : index
    %9 = vector.load %arg4[%c0_6, %c0_7] : memref<64x16xf32, #tpu.memory_space<vmem>>, vector<64x16xf32>
    %cst_8 = arith.constant dense<0.000000e+00> : vector<256x16xf32>
    %10 = tpu.matmul %8, %9, %cst_8 {dimension_numbers = #tpu.dot_dimension_numbers<[1], [0], [0], [1], [0, 0, 1, 1], [], []>, precision = #tpu.contract_precision<fp32>} : vector<256x64xf32>, vector<64x16xf32>, vector<256x16xf32> -> vector<256x16xf32>
    %c0_9 = arith.constant 0 : index
    %c0_10 = arith.constant 0 : index
    %11 = vector.load %arg5[%c0_9, %c0_10] : memref<1x16xf32, #tpu.memory_space<vmem>>, vector<1x16xf32>
    %12 = vector.broadcast %11 : vector<1x16xf32> to vector<256x16xf32>
    %13 = arith.addf %10, %12 : vector<256x16xf32>
    %cst_11 = arith.constant dense<0xFF800000> : vector<256xf32>
    %14 = vector.multi_reduction <maximumf>, %13, %cst_11 [1] : vector<256x16xf32> to vector<256xf32>
    %15 = vector.shape_cast %14 : vector<256xf32> to vector<256x1xf32>
    %16 = vector.broadcast %15 : vector<256x1xf32> to vector<256x16xf32>
    %17 = arith.subf %13, %16 : vector<256x16xf32>
    %18 = math.exp %17 : vector<256x16xf32>
    %cst_12 = arith.constant dense<0.000000e+00> : vector<256xf32>
    %19 = vector.multi_reduction <add>, %18, %cst_12 [1] : vector<256x16xf32> to vector<256xf32>
    %20 = vector.shape_cast %19 : vector<256xf32> to vector<256x1xf32>
    %21 = math.log %20 : vector<256x1xf32>
    %22 = vector.broadcast %21 : vector<256x1xf32> to vector<256x16xf32>
    %23 = arith.subf %17, %22 : vector<256x16xf32>
    %c0_13 = arith.constant 0 : index
    %c0_14 = arith.constant 0 : index
    %24 = vector.load %arg6[%c0_13, %c0_14] : memref<256x16xf32, #tpu.memory_space<vmem>>, vector<256x16xf32>
    tpu.vector_store %arg6[%c0_13, %c0_14], %23 {strides = array<i32>} : memref<256x16xf32, #tpu.memory_space<vmem>>, vector<256x16xf32>,
    return
  }
  func.func @transform_0(%arg0: i32) -> (i32, i32) {
    %c0_i32 = arith.constant 0 : i32
    %c0_i32_0 = arith.constant 0 : i32
    return %arg0, %c0_i32 : i32, i32
  }
  func.func @transform_1(%arg0: i32) -> (i32, i32) {
    %c0_i32 = arith.constant 0 : i32
    %c0_i32_0 = arith.constant 0 : i32
    %c0_i32_1 = arith.constant 0 : i32
    return %c0_i32, %c0_i32_0 : i32, i32
  }
  func.func @transform_2(%arg0: i32) -> (i32, i32) {
    %c0_i32 = arith.constant 0 : i32
    %c0_i32_0 = arith.constant 0 : i32
    %c0_i32_1 = arith.constant 0 : i32
    return %c0_i32, %c0_i32_0 : i32, i32
  }
  func.func @transform_3(%arg0: i32) -> (i32, i32) {
    %c0_i32 = arith.constant 0 : i32
    %c0_i32_0 = arith.constant 0 : i32
    %c0_i32_1 = arith.constant 0 : i32
    return %c0_i32, %c0_i32_0 : i32, i32
  }
  func.func @transform_4(%arg0: i32) -> (i32, i32) {
    %c0_i32 = arith.constant 0 : i32
    %c0_i32_0 = arith.constant 0 : i32
    %c0_i32_1 = arith.constant 0 : i32
    return %c0_i32, %c0_i32_0 : i32, i32
  }
  func.func @transform_5(%arg0: i32) -> (i32, i32) {
    %c0_i32 = arith.constant 0 : i32
    %c0_i32_0 = arith.constant 0 : i32
    return %arg0, %c0_i32 : i32, i32
  }
}

</mosaic_0001>

<bundles_post_ra>
// kernel: tpu_custom_call.1
= control target key start
LH: loop header
LB: loop body
LE: loop exit
PB: predicated region body
PF: predicated region fallthrough
CT: control target
= control target key end

     0   :  { %s4203_s18 = smov 0   ;;  %s5427_s0 = inlined_call_operand.vmem [shape: f32[512,64], index: 0, kind: input, shape index: {}]   ;;  %s5428_s1 = inlined_call_operand.vmem [shape: bf16[64,64], index: 1, kind: input, shape index: {}]   ;;  %s5429_s2 = inlined_call_operand.vmem [shape: f32[1,64], index: 2, kind: input, shape index: {}]   ;;  %s5430_s3 = inlined_call_operand.vmem [shape: f32[64,16], index: 3, kind: input, shape index: {}]   ;;  %s5431_s4 = inlined_call_operand.vmem [shape: f32[1,16], index: 4, kind: input, shape index: {}]   ;;  %s5432_s5 = inlined_call_operand.vmem [shape: f32[512,16], index: 5, kind: output, shape index: {}]  }
   0x1 LB: > { %s3012_s19 = sadd.s32 4294967295, %s4171_s18   ;;  %p3016_p0 = scmp.ge.s32.totalorder %s4171_s18, 1  ;;  %s4171_s18 = sphi %s4203_s18, %s15_s18  }
   0x2   : > { %p188_p1 = scmp.lt.s32.totalorder %s4171_s18, 3 }
   0x4   : > { %p189_p2 = pnand %p3016_p0, %p188_p1 }
   0x6   : > { %192 = sbr.rel (%p189_p2) target bundleno = 1042 (0x412), region = 40 }
   0xd   : > { %v4033_v0 = vld [vmem:[%s5428_s1] sm:$0xff]   ;;  %s3017_s22 = sshll.u32 %s3012_s19, 5  ;;  %v4034_v1 = vld [vmem:[%s5428_s1 + $0x8] sm:$0xff]   ;;  %v4035_v2 = vld [vmem:[%s5428_s1 + $0x10] sm:$0xff]   ;;  %vm316_vm0 = vcmask 523264   ;;  %vm2539_vm1 = vcmask 130048  }
   0xe   : > { %p217_p3 = scmp.lt.s32.totalorder %s3017_s22, 63  ;;  %3305 = vmatprep.subr.bf16.mxu0 %v4033_v0  ;;  %v4036_v5 = vld [vmem:[%s5428_s1 + $0x18] sm:$0xff]   ;;  %v558_v52 = vld [vmem:[%s5430_s3] sm:$0xff]  ;;  %v559_v53 = vld [vmem:[%s5430_s3 + $0x8] sm:$0xff] }
   0xf   : > { %3306 = vmatpush3.bf16.msra.mxu0 %v4033_v0  ;;  %v670_v54 = vand.u32 4294901760, %v558_v52  ;;  %v673_v55 = vand.u32 4294901760, %v559_v53  ;;  %v560_v57 = vld [vmem:[%s5430_s3 + $0x10] sm:$0xff]  ;;  %v561_v58 = vld [vmem:[%s5430_s3 + $0x18] sm:$0xff]  ;;  %v562_v62 = vld [vmem:[%s5430_s3 + $0x20] sm:$0xff] }
  0x10   : > { %s5584_s22 = smov (!%p217_p3, %s3017_s22), 63  ;;  %3307 = vmatprep.subr.bf16.mxu0 %v4034_v1  ;;  %v676_v59 = vand.u32 4294901760, %v560_v57  ;;  %v679_v60 = vand.u32 4294901760, %v561_v58  ;;  %v563_v63 = vld [vmem:[%s5430_s3 + $0x28] sm:$0xff]  ;;  %v682_v0 = vand.u32 4294901760, %v562_v62 }
  0x11   : > { %s3018_s27 = sshll.u32 %s5584_s22, 3  ;;  %v4287_v56 = vpack.c.bf16 %v673_v55, %v670_v54 }
  0x12   : > { %s4228_s30 = scalar_lea.vmem %s5427_s0, %s3018_s27  ;;  %v4297_v61 = vpack.c.bf16 %v679_v60, %v676_v59  ;;  %s5326_s8 = scalar_lea.vmem %s5432_s5, %s3018_s27 }
  0x13   : > { %3308 = vmatpush3.bf16.msra.mxu0 %v4034_v1  ;;  %v229_v3 = vld [vmem:[%s4228_s30] sm:$0xff]  ;;  %v230_v4 = vld [vmem:[%s4228_s30 + $0x8] sm:$0xff]  ;;  %v231_v7 = vld [vmem:[%s4228_s30 + $0x10] sm:$0xff]  ;;  %v685_v1 = vand.u32 4294901760, %v563_v63 }
  0x14   : > { %3309 = vmatprep.subr.bf16.mxu0 %v4035_v2  ;;  %v261_v6 = vpack.c.bf16 %v230_v4, %v229_v3  ;;  %v232_v8 = vld [vmem:[%s4228_s30 + $0x18] sm:$0xff]  ;;  %v233_v9 = vld [vmem:[%s4228_s30 + $0x20] sm:$0xff]  ;;  %v234_v10 = vld [vmem:[%s4228_s30 + $0x28] sm:$0xff]  ;;  %5501 = vst [vmem:[#allocation2_spill] sm:$0xff] %v4297_v61 }
  0x15   : > { %v262_v11 = vpack.c.bf16 %v232_v8, %v231_v7  ;;  %v263_v12 = vpack.c.bf16 %v234_v10, %v233_v9  ;;  %v235_v13 = vld [vmem:[%s4228_s30 + $0x30] sm:$0xff]  ;;  %v236_v14 = vld [vmem:[%s4228_s30 + $0x38] sm:$0xff]  ;;  %v237_v15 = vld [vmem:[%s4228_s30 + $0x40] sm:$0xff]  ;;  %v1064_v8 = vsub.f32 %v558_v52, %v670_v54  ;;  %v1071_v9 = vsub.f32 %v559_v53, %v673_v55 }
  0x16   : > { %3313 = vmatprep.mubr.msk.bf16.mxu0 %vm316_vm0, %v261_v6  ;;  %v238_v16 = vld [vmem:[%s4228_s30 + $0x48] sm:$0xff]  ;;  %v264_v17 = vpack.c.bf16 %v236_v14, %v235_v13  ;;  %v239_v19 = vld [vmem:[%s4228_s30 + $0x50] sm:$0xff]  ;;  %v240_v20 = vld [vmem:[%s4228_s30 + $0x58] sm:$0xff]  ;;  %v1092_v14 = vsub.f32 %v562_v62, %v682_v0 }
  0x17   : > { %3310 = vmatpush3.bf16.msra.mxu0 %v4035_v2  ;;  %v265_v18 = vpack.c.bf16 %v238_v16, %v237_v15  ;;  %v241_v21 = vld [vmem:[%s4228_s30 + $0x60] sm:$0xff]  ;;  %v242_v22 = vld [vmem:[%s4228_s30 + $0x68] sm:$0xff]  ;;  %v266_v23 = vpack.c.bf16 %v240_v20, %v239_v19  ;;  %v243_v25 = vld [vmem:[%s4228_s30 + $0x70] sm:$0xff]  ;;  %v4307_v2 = vpack.c.bf16 %v685_v1, %v682_v0  ;;  %v4321_v10 = vpack.c.bf16 %v1071_v9, %v1064_v8 }
  0x18   : > { %3311 = vmatprep.subr.bf16.mxu0 %v4036_v5  ;;  %v267_v24 = vpack.c.bf16 %v242_v22, %v241_v21  ;;  %v244_v26 = vld [vmem:[%s4228_s30 + $0x78] sm:$0xff]  ;;  %v245_v27 = vld [vmem:[%s4228_s30 + $0x80] sm:$0xff]  ;;  %v246_v28 = vld [vmem:[%s4228_s30 + $0x88] sm:$0xff]  ;;  %v1099_v15 = vsub.f32 %v563_v63, %v685_v1  ;;  %v1065_v20 = vand.u32 4294901760, %v1064_v8  ;;  %v1072_v21 = vand.u32 4294901760, %v1071_v9 }
  0x19   : > { %v268_v29 = vpack.c.bf16 %v244_v26, %v243_v25  ;;  %v269_v30 = vpack.c.bf16 %v246_v28, %v245_v27  ;;  %v247_v31 = vld [vmem:[%s4228_s30 + $0x90] sm:$0xff]  ;;  %v248_v32 = vld [vmem:[%s4228_s30 + $0x98] sm:$0xff]  ;;  %v249_v33 = vld [vmem:[%s4228_s30 + $0xa0] sm:$0xff]  ;;  %5502 = vst [vmem:[#allocation3_spill] sm:$0xff] %v4307_v2  ;;  %3825 = vmatprep.subr.bf16.mxu1 %v4321_v10 }
  0x1a   : > { %v250_v34 = vld [vmem:[%s4228_s30 + $0xa8] sm:$0xff]  ;;  %v270_v35 = vpack.c.bf16 %v248_v32, %v247_v31  ;;  %v251_v37 = vld [vmem:[%s4228_s30 + $0xb0] sm:$0xff]  ;;  %v252_v38 = vld [vmem:[%s4228_s30 + $0xb8] sm:$0xff]  ;;  %3829 = vmatpush3.bf16.msra.mxu1 %v4321_v10  ;;  %v4329_v16 = vpack.c.bf16 %v1099_v15, %v1092_v14  ;;  %v1066_v22 = vsub.f32 %v1064_v8, %v1065_v20 }
  0x1b   : > { %3312 = vmatpush3.bf16.msra.mxu0 %v4036_v5  ;;  %v271_v36 = vpack.c.bf16 %v250_v34, %v249_v33  ;;  %v253_v39 = vld [vmem:[%s4228_s30 + $0xc0] sm:$0xff]  ;;  %v254_v40 = vld [vmem:[%s4228_s30 + $0xc8] sm:$0xff]  ;;  %v272_v41 = vpack.c.bf16 %v252_v38, %v251_v37  ;;  %v255_v43 = vld [vmem:[%s4228_s30 + $0xd0] sm:$0xff]  ;;  %v1093_v33 = vand.u32 4294901760, %v1092_v14  ;;  %v1100_v34 = vand.u32 4294901760, %v1099_v15 }
  0x1c   : > { %v273_v42 = vpack.c.bf16 %v254_v40, %v253_v39  ;;  %v256_v44 = vld [vmem:[%s4228_s30 + $0xd8] sm:$0xff]  ;;  %v257_v45 = vld [vmem:[%s4228_s30 + $0xe0] sm:$0xff]  ;;  %v258_v46 = vld [vmem:[%s4228_s30 + $0xe8] sm:$0xff]  ;;  %3730 = vmatprep.subr.bf16.mxu0 %v4287_v56 }
  0x1d   : > { %v274_v47 = vpack.c.bf16 %v256_v44, %v255_v43  ;;  %v275_v48 = vpack.c.bf16 %v258_v46, %v257_v45  ;;  %v259_v49 = vld [vmem:[%s4228_s30 + $0xf0] sm:$0xff]  ;;  %v260_v50 = vld [vmem:[%s4228_s30 + $0xf8] sm:$0xff]  ;;  %v1101_v37 = vsub.f32 %v1099_v15, %v1100_v34  ;;  %v4345_v45 = vpack.c.bf16 %v1072_v21, %v1065_v20  ;;  %v4358_v52 = vld [vmem:[%s5429_s2] ss:$0 sm:$0xff] }
  0x1e   : > { %3314 = vmatmul.mubr.msk.bf16.vlgmr.msra.gmra.mrb[0].mxu0 %vm316_vm0, %v262_v11  ;;  %v276_v51 = vpack.c.bf16 %v260_v50, %v259_v49  ;;  %v564_v3 = vld [vmem:[%s5430_s3 + $0x30] sm:$0xff]  ;;  %v565_v4 = vld [vmem:[%s5430_s3 + $0x38] sm:$0xff]  ;;  %v1078_v11 = vsub.f32 %v560_v57, %v676_v59  ;;  %v4351_v50 = vpack.c.bf16 %v1100_v34, %v1093_v33 }
  0x1f   : > { %3317 = vmatprep.mubr.msk.bf16.mxu0 %vm316_vm0, %v263_v12  ;;  %3732 = vmatpush3.bf16.msra.mxu0 %v4287_v56  ;;  %v688_v5 = vand.u32 4294901760, %v564_v3  ;;  %v691_v6 = vand.u32 4294901760, %v565_v4  ;;  %v1085_v12 = vsub.f32 %v561_v58, %v679_v60  ;;  %v1102_v39 = vand.u32 4294901760, %v1101_v37 }
  0x20   : > { %3734 = vmatprep.subr.bf16.mxu0 %v4297_v61  ;;  %v1079_v26 = vand.u32 4294901760, %v1078_v11 }
  0x21   : > { %v4317_v7 = vpack.c.bf16 %v691_v6, %v688_v5  ;;  %v4325_v13 = vpack.c.bf16 %v1085_v12, %v1078_v11  ;;  %v1086_v27 = vand.u32 4294901760, %v1085_v12 }
  0x23   : > { %3736 = vmatpush3.bf16.msra.mxu0 %v4297_v61  ;;  %5503 = vst [vmem:[#allocation4_spill] sm:$0xff] %v4317_v7  ;;  %3826 = vmatprep.subr.bf16.mxu1 %v4325_v13  ;;  %v4349_v49 = vpack.c.bf16 %v1086_v27, %v1079_v26 }
  0x24   : > { %3738 = vmatprep.subr.bf16.mxu0 %v4307_v2  ;;  %3830 = vmatpush3.bf16.msra.mxu1 %v4325_v13 }
  0x25   : > { %3827 = vmatprep.subr.bf16.mxu1 %v4329_v16 }
  0x26   : > { %3318 = vmatmul.mubr.msk.bf16.gmra.mrb[4].mxu0 %vm316_vm0, %v264_v17  ;;  %v1106_v17 = vsub.f32 %v564_v3, %v688_v5 }
  0x27   : > { %3321 = vmatprep.mubr.msk.bf16.mxu0 %vm316_vm0, %v265_v18  ;;  %3740 = vmatpush3.bf16.msra.mxu0 %v4307_v2  ;;  %v1113_v18 = vsub.f32 %v565_v4, %v691_v6 }
  0x28   : > { %3742 = vmatprep.subr.bf16.mxu0 %v4317_v7  ;;  %3831 = vmatpush3.bf16.msra.mxu1 %v4329_v16  ;;  %v1107_v40 = vand.u32 4294901760, %v1106_v17 }
  0x29   : > { %v4333_v19 = vpack.c.bf16 %v1113_v18, %v1106_v17 }
  0x2a   : > { %v1108_v43 = vsub.f32 %v1106_v17, %v1107_v40 }
  0x2b   : > { %3744 = vmatpush3.bf16.msra.mxu0 %v4317_v7  ;;  %3828 = vmatprep.subr.bf16.mxu1 %v4333_v19 }
  0x2c   : > { %3832 = vmatpush3.bf16.msra.mxu1 %v4333_v19  ;;  %v1109_v46 = vand.u32 4294901760, %v1108_v43 }
  0x2d   : > { %3778 = vmatprep.subr.bf16.mxu1 %v4287_v56 }
  0x2e   : > { %3322 = vmatmul.mubr.msk.bf16.gmra.mrb[8].mxu0 %vm316_vm0, %v266_v23  ;;  %v1073_v23 = vsub.f32 %v1071_v9, %v1072_v21 }
  0x2f   : > { %3325 = vmatprep.mubr.msk.bf16.mxu0 %vm316_vm0, %v267_v24  ;;  %v1067_v24 = vand.u32 4294901760, %v1066_v22 }
  0x30   : > { %v1074_v25 = vand.u32 4294901760, %v1073_v23 }
  0x32   : > { %v4338_v28 = vpack.c.bf16 %v1074_v25, %v1067_v24 }
  0x34   : > { %3746 = vmatprep.subr.bf16.mxu0 %v4338_v28 }
  0x36   : > { %3326 = vmatmul.mubr.msk.bf16.gmra.mrb[12].mxu0 %vm316_vm0, %v268_v29  ;;  %v1080_v29 = vsub.f32 %v1078_v11, %v1079_v26 }
  0x37   : > { %3329 = vmatprep.mubr.msk.bf16.mxu0 %vm316_vm0, %v269_v30  ;;  %v1087_v30 = vsub.f32 %v1085_v12, %v1086_v27 }
  0x38   : > { %v1081_v31 = vand.u32 4294901760, %v1080_v29 }
  0x39   : > { %v1088_v32 = vand.u32 4294901760, %v1087_v30 }
  0x3e   : > { %3330 = vmatmul.mubr.msk.bf16.gmra.mrb[16].mxu0 %vm316_vm0, %v270_v35  ;;  %v4341_v35 = vpack.c.bf16 %v1088_v32, %v1081_v31 }
  0x3f   : > { %3333 = vmatprep.mubr.msk.bf16.mxu0 %vm316_vm0, %v271_v36  ;;  %v1094_v36 = vsub.f32 %v1092_v14, %v1093_v33 }
  0x41   : > { %v1095_v38 = vand.u32 4294901760, %v1094_v36 }
  0x46   : > { %3334 = vmatmul.mubr.msk.bf16.gmra.mrb[20].mxu0 %vm316_vm0, %v272_v41  ;;  %v1114_v41 = vand.u32 4294901760, %v1113_v18 }
  0x47   : > { %3337 = vmatprep.mubr.msk.bf16.mxu0 %vm316_vm0, %v273_v42  ;;  %v4343_v42 = vpack.c.bf16 %v1102_v39, %v1095_v38 }
  0x48   : > { %v1115_v44 = vsub.f32 %v1113_v18, %v1114_v41 }
  0x4e   : > { %3338 = vmatmul.mubr.msk.bf16.gmra.mrb[24].mxu0 %vm316_vm0, %v274_v47  ;;  %v1116_v47 = vand.u32 4294901760, %v1115_v44 }
  0x4f   : > { %3341 = vmatprep.mubr.msk.bf16.mxu0 %vm316_vm0, %v275_v48 }
  0x50   : > { %v4347_v48 = vpack.c.bf16 %v1116_v47, %v1109_v46 }
  0x56   : > { %3342 = vmatmul.mubr.msk.bf16.gmra.mrb[28].mxu0 %vm316_vm0, %v276_v51  ;;  %v4353_v51 = vpack.c.bf16 %v1114_v41, %v1107_v40 }
  0xf1   : > { %v3315_v53 = vpop.f32.mrb[0].mxu0 }
  0xf2   : > { %v408_v54 = vadd.f32 %v3315_v53, %v4358_v52  ;;  %v399_v55 = vpop.f32.mrb[1].mxu0 }
  0xf3   : > { %v400_v57 = vadd.f32 %v4358_v52, %v399_v55  ;;  %v3316_v58 = vpop.f32.mrb[2].mxu0 }
  0xf4   : > { %v528_v59 = vmax.f32 %v408_v54, 0.0  ;;  %v411_v60 = vadd.f32 %v3316_v58, %v4358_v52  ;;  %v402_v62 = vpop.f32.mrb[3].mxu0 }
  0xf5   : > { %v526_v63 = vmax.f32 %v400_v57, 0.0  ;;  %v403_v0 = vadd.f32 %v4358_v52, %v402_v62 }
  0xf6   : > { %v580_v1 = vsel %vm316_vm0, %v528_v59, 0  ;;  %v529_v3 = vmax.f32 %v411_v60, 0.0 }
  0xf7   : > { %v4365_v4 = vand.u32 4294901760, %v580_v1  ;;  %v574_v5 = vsel %vm316_vm0, %v526_v63, 0  ;;  %v527_v6 = vmax.f32 %v403_v0, 0.0 }
  0xf8   : > { %v4368_v8 = vand.u32 4294901760, %v574_v5  ;;  %v583_v9 = vsel %vm316_vm0, %v529_v3, 0 }
  0xf9   : > { %v4372_v11 = vsub.f32 %v580_v1, %v4365_v4  ;;  %v4374_v12 = vand.u32 4294901760, %v583_v9  ;;  %v577_v14 = vsel %vm316_vm0, %v527_v6, 0  ;;  %v3319_v15 = vpop.f32.mrb[4].mxu0 }
  0xfa   : > { %v4378_v17 = vsub.f32 %v574_v5, %v4368_v8  ;;  %v4380_v18 = vand.u32 4294901760, %v577_v14  ;;  %v424_v20 = vadd.f32 %v3319_v15, %v4358_v52  ;;  %v415_v21 = vpop.f32.mrb[5].mxu0 }
  0xfb   : > { %v4384_v22 = vsub.f32 %v583_v9, %v4374_v12  ;;  %v416_v23 = vadd.f32 %v4358_v52, %v415_v21  ;;  %v3320_v24 = vpop.f32.mrb[6].mxu0  ;;  %v5442_v25 = vand.u32 4294901760, %v4372_v11 }
  0xfc   : > { %v4389_v26 = vsub.f32 %v577_v14, %v4380_v18  ;;  %v532_v27 = vmax.f32 %v424_v20, 0.0  ;;  %v427_v29 = vadd.f32 %v3320_v24, %v4358_v52  ;;  %v418_v30 = vpop.f32.mrb[7].mxu0  ;;  %v5445_v31 = vand.u32 4294901760, %v4378_v17 }
  0xfd   : > { %v530_v32 = vmax.f32 %v416_v23, 0.0  ;;  %v419_v33 = vadd.f32 %v4358_v52, %v418_v30  ;;  %v5441_v34 = vand.u32 4294901760, %v4384_v22  ;;  %v765_v44 = vsub.f32 %v4372_v11, %v5442_v25 }
  0xfe   : > { %v5443_v36 = vand.u32 4294901760, %v4389_v26  ;;  %v592_v37 = vsel %vm316_vm0, %v532_v27, 0  ;;  %v533_v38 = vmax.f32 %v427_v29, 0.0  ;;  %v745_v39 = vsub.f32 %v4378_v17, %v5445_v31 }
  0xff   : > { %v4400_v40 = vand.u32 4294901760, %v592_v37  ;;  %v586_v41 = vsel %vm316_vm0, %v530_v32, 0  ;;  %v531_v43 = vmax.f32 %v419_v33, 0.0  ;;  %v775_v60 = vsub.f32 %v4384_v22, %v5441_v34 }
 0x100   : > { %v755_v46 = vsub.f32 %v4389_v26, %v5443_v36  ;;  %v4409_v47 = vand.u32 4294901760, %v586_v41  ;;  %v595_v53 = vsel %vm316_vm0, %v533_v38, 0  ;;  %v746_v54 = vand.u32 4294901760, %v745_v39 }
 0x101   : > { %v4413_v55 = vsub.f32 %v592_v37, %v4400_v40  ;;  %v4415_v57 = vand.u32 4294901760, %v595_v53  ;;  %v589_v58 = vsel %vm316_vm0, %v531_v43, 0  ;;  %v3323_v59 = vpop.f32.mrb[8].mxu0  ;;  %v766_v14 = vand.u32 4294901760, %v765_v44 }
 0x102   : > { %v756_v62 = vand.u32 4294901760, %v755_v46  ;;  %v4422_v63 = vsub.f32 %v586_v41, %v4409_v47  ;;  %v4424_v0 = vand.u32 4294901760, %v589_v58  ;;  %v440_v1 = vadd.f32 %v3323_v59, %v4358_v52  ;;  %v431_v3 = vpop.f32.mrb[9].mxu0  ;;  %3361 = vmatprep.mubr.f32.mxu0 %v746_v54 }
 0x103   : > { %v4428_v5 = vsub.f32 %v595_v53, %v4415_v57  ;;  %v432_v6 = vadd.f32 %v4358_v52, %v431_v3  ;;  %v3324_v9 = vpop.f32.mrb[10].mxu0  ;;  %v5437_v15 = vand.u32 4294901760, %v4413_v55  ;;  %v776_v32 = vand.u32 4294901760, %v775_v60 }
 0x104   : > { %v4433_v20 = vsub.f32 %v589_v58, %v4424_v0  ;;  %v536_v21 = vmax.f32 %v440_v1, 0.0  ;;  %v443_v23 = vadd.f32 %v3324_v9, %v4358_v52  ;;  %v434_v24 = vpop.f32.mrb[11].mxu0  ;;  %3362 = vmatmul.mubr.f32.vlgmr.msra.gmra.mrb[32].mxu0 %v756_v62  ;;  %v5440_v27 = vand.u32 4294901760, %v4422_v63 }
 0x105   : > { %v534_v29 = vmax.f32 %v432_v6, 0.0  ;;  %v435_v30 = vadd.f32 %v4358_v52, %v434_v24  ;;  %3364 = vmatprep.mubr.f32.mxu0 %v766_v14  ;;  %v5434_v33 = vand.u32 4294901760, %v4428_v5  ;;  %3748 = vmatpush3.bf16.msra.mxu0 %v4338_v28  ;;  %v805_v28 = vsub.f32 %v4413_v55, %v5437_v15 }
 0x106   : > { %v604_v37 = vsel %vm316_vm0, %v536_v21, 0  ;;  %v537_v38 = vmax.f32 %v443_v23, 0.0  ;;  %v785_v39 = vsub.f32 %v4422_v63, %v5440_v27  ;;  %v5439_v41 = vand.u32 4294901760, %v4433_v20  ;;  %3750 = vmatprep.subr.bf16.mxu0 %v4341_v35 }
 0x107   : > { %v4446_v43 = vand.u32 4294901760, %v604_v37  ;;  %v598_v44 = vsel %vm316_vm0, %v534_v29, 0  ;;  %v535_v46 = vmax.f32 %v435_v30, 0.0  ;;  %v815_v6 = vsub.f32 %v4428_v5, %v5434_v33 }
 0x108   : > { %v4452_v53 = vand.u32 4294901760, %v598_v44  ;;  %v607_v54 = vsel %vm316_vm0, %v537_v38, 0  ;;  %3365 = vmatmul.mubr.f32.gmra.mrb[34].mxu0 %v776_v32  ;;  %v786_v58 = vand.u32 4294901760, %v785_v39  ;;  %v795_v59 = vsub.f32 %v4433_v20, %v5439_v41 }
 0x109   : > { %v4459_v60 = vsub.f32 %v604_v37, %v4446_v43  ;;  %v4461_v62 = vand.u32 4294901760, %v607_v54  ;;  %v601_v1 = vsel %vm316_vm0, %v535_v46, 0  ;;  %v3327_v3 = vpop.f32.mrb[12].mxu0  ;;  %3752 = vmatpush3.bf16.msra.mxu0 %v4341_v35  ;;  %v806_v37 = vand.u32 4294901760, %v805_v28 }
 0x10a   : > { %v4469_v9 = vsub.f32 %v598_v44, %v4452_v53  ;;  %v4471_v14 = vand.u32 4294901760, %v601_v1  ;;  %v456_v21 = vadd.f32 %v3327_v3, %v4358_v52  ;;  %v447_v23 = vpop.f32.mrb[13].mxu0  ;;  %3367 = vmatprep.mubr.f32.mxu0 %v786_v58  ;;  %v796_v24 = vand.u32 4294901760, %v795_v59  ;;  %3754 = vmatprep.subr.bf16.mxu0 %v4343_v42 }
 0x10b   : > { %v4476_v29 = vsub.f32 %v607_v54, %v4461_v62  ;;  %v448_v30 = vadd.f32 %v4358_v52, %v447_v23  ;;  %v3328_v32 = vpop.f32.mrb[14].mxu0  ;;  %v5435_v35 = vand.u32 4294901760, %v4459_v60  ;;  %v816_v3 = vand.u32 4294901760, %v815_v6 }
 0x10c   : > { %v4481_v38 = vsub.f32 %v601_v1, %v4471_v14  ;;  %v540_v39 = vmax.f32 %v456_v21, 0.0  ;;  %v459_v44 = vadd.f32 %v3328_v32, %v4358_v52  ;;  %v450_v46 = vpop.f32.mrb[15].mxu0  ;;  %3368 = vmatmul.mubr.f32.gmra.mrb[36].mxu0 %v796_v24  ;;  %v5433_v58 = vand.u32 4294901760, %v4469_v9 }
 0x10d   : > { %v538_v59 = vmax.f32 %v448_v30, 0.0  ;;  %v451_v54 = vadd.f32 %v4358_v52, %v450_v46  ;;  %3370 = vmatprep.mubr.f32.mxu0 %v806_v37  ;;  %v5438_v23 = vand.u32 4294901760, %v4476_v29  ;;  %3756 = vmatpush3.bf16.msra.mxu0 %v4343_v42  ;;  %v845_v42 = vsub.f32 %v4459_v60, %v5435_v35 }
 0x10e   : > { %v616_v28 = vsel %vm316_vm0, %v540_v39, 0  ;;  %v541_v1 = vmax.f32 %v459_v44, 0.0  ;;  %v825_v21 = vsub.f32 %v4469_v9, %v5433_v58  ;;  %v5436_v24 = vand.u32 4294901760, %v4481_v38  ;;  %3758 = vmatprep.subr.bf16.mxu0 %v4347_v48 }
 0x10f   : > { %v4494_v30 = vand.u32 4294901760, %v616_v28  ;;  %v610_v32 = vsel %vm316_vm0, %v538_v59, 0  ;;  %v539_v6 = vmax.f32 %v451_v54, 0.0  ;;  %v855_v35 = vsub.f32 %v4476_v29, %v5438_v23 }
 0x110   : > { %v4500_v37 = vand.u32 4294901760, %v610_v32  ;;  %v619_v39 = vsel %vm316_vm0, %v541_v1, 0  ;;  %3371 = vmatmul.mubr.f32.gmra.mrb[38].mxu0 %v816_v3  ;;  %v826_v44 = vand.u32 4294901760, %v825_v21  ;;  %v835_v46 = vsub.f32 %v4481_v38, %v5436_v24 }
 0x111   : > { %5504 = vst [vmem:[#allocation5_spill] sm:$0xff] %v4494_v30  ;;  %v4507_v58 = vsub.f32 %v616_v28, %v4494_v30  ;;  %v4509_v33 = vand.u32 4294901760, %v619_v39  ;;  %v613_v59 = vsel %vm316_vm0, %v539_v6, 0  ;;  %v3331_v54 = vpop.f32.mrb[16].mxu0  ;;  %3760 = vmatpush3.bf16.msra.mxu0 %v4347_v48  ;;  %v846_v41 = vand.u32 4294901760, %v845_v42 }
 0x112   : > { %5505 = vst [vmem:[#allocation6_spill] sm:$0xff] %v4500_v37  ;;  %v4517_v3 = vsub.f32 %v610_v32, %v4500_v37  ;;  %v4519_v1 = vand.u32 4294901760, %v613_v59  ;;  %v472_v21 = vadd.f32 %v3331_v54, %v4358_v52  ;;  %v463_v28 = vpop.f32.mrb[17].mxu0  ;;  %3373 = vmatprep.mubr.f32.mxu0 %v826_v44  ;;  %v836_v24 = vand.u32 4294901760, %v835_v46  ;;  %3762 = vmatprep.subr.bf16.mxu0 %v4321_v10 }
 0x113   : > { %5506 = vst [vmem:[#allocation7_spill] sm:$0xff] %v4509_v33  ;;  %v4524_v6 = vsub.f32 %v619_v39, %v4509_v33  ;;  %v464_v15 = vadd.f32 %v4358_v52, %v463_v28  ;;  %v3332_v23 = vpop.f32.mrb[18].mxu0  ;;  %v5446_v48 = vand.u32 4294901760, %v4507_v58  ;;  %v856_v25 = vand.u32 4294901760, %v855_v35 }
 0x114   : > { %5507 = vst [vmem:[#allocation8_spill] sm:$0xff] %v4519_v1  ;;  %v4529_v32 = vsub.f32 %v613_v59, %v4519_v1  ;;  %v544_v27 = vmax.f32 %v472_v21, 0.0  ;;  %v475_v54 = vadd.f32 %v3332_v23, %v4358_v52  ;;  %v466_v34 = vpop.f32.mrb[19].mxu0  ;;  %3374 = vmatmul.mubr.f32.gmra.mrb[40].mxu0 %v836_v24  ;;  %v5444_v44 = vand.u32 4294901760, %v4517_v3 }
 0x115   : > { %5508 = vst [vmem:[#allocation9_spill] sm:$0xff] %v4524_v6  ;;  %v542_v46 = vmax.f32 %v464_v15, 0.0  ;;  %v467_v39 = vadd.f32 %v4358_v52, %v466_v34  ;;  %3376 = vmatprep.mubr.f32.mxu0 %v846_v41  ;;  %v5456_v28 = vand.u32 4294901760, %v4524_v6  ;;  %v885_v34 = vsub.f32 %v4507_v58, %v5446_v48 }
 0x116   : > { %v628_v42 = vsel %vm316_vm0, %v544_v27, 0  ;;  %v545_v36 = vmax.f32 %v475_v54, 0.0  ;;  %v865_v59 = vsub.f32 %v4517_v3, %v5444_v44  ;;  %v5449_v23 = vand.u32 4294901760, %v4529_v32 }
 0x117   : > { %v4540_v21 = vand.u32 4294901760, %v628_v42  ;;  %v622_v24 = vsel %vm316_vm0, %v542_v46, 0  ;;  %v543_v15 = vmax.f32 %v467_v39, 0.0  ;;  %v895_v48 = vsub.f32 %v4524_v6, %v5456_v28 }
 0x118   : > { %v4546_v41 = vand.u32 4294901760, %v622_v24  ;;  %v631_v27 = vsel %vm316_vm0, %v545_v36, 0  ;;  %3377 = vmatmul.mubr.f32.gmra.mrb[42].mxu0 %v856_v25  ;;  %v866_v35 = vand.u32 4294901760, %v865_v59  ;;  %v875_v54 = vsub.f32 %v4529_v32, %v5449_v23 }
 0x119   : > { %5509 = vst [vmem:[#allocation10_spill] sm:$0xff] %v4540_v21  ;;  %v4552_v44 = vand.u32 4294901760, %v631_v27  ;;  %v625_v31 = vsel %vm316_vm0, %v543_v15, 0  ;;  %v3335_v46 = vpop.f32.mrb[20].mxu0  ;;  %v4556_v39 = vsub.f32 %v628_v42, %v4540_v21  ;;  %v886_v1 = vand.u32 4294901760, %v885_v34 }
 0x11a   : > { %5510 = vst [vmem:[#allocation11_spill] sm:$0xff] %v4546_v41  ;;  %v4561_v33 = vand.u32 4294901760, %v625_v31  ;;  %v488_v25 = vadd.f32 %v3335_v46, %v4358_v52  ;;  %v479_v36 = vpop.f32.mrb[21].mxu0  ;;  %3379 = vmatprep.mubr.f32.mxu0 %v866_v35  ;;  %v876_v59 = vand.u32 4294901760, %v875_v54  ;;  %v4565_v23 = vsub.f32 %v622_v24, %v4546_v41 }
 0x11b   : > { %5511 = vst [vmem:[#allocation12_spill] sm:$0xff] %v4552_v44  ;;  %5512 = vst [vmem:[#allocation13_spill] sm:$0xff] %v4556_v39  ;;  %v480_v15 = vadd.f32 %v4358_v52, %v479_v36  ;;  %v3336_v30 = vpop.f32.mrb[22].mxu0  ;;  %v4569_v42 = vsub.f32 %v631_v27, %v4552_v44  ;;  %v5464_v21 = vand.u32 4294901760, %v4556_v39  ;;  %v896_v27 = vand.u32 4294901760, %v895_v48 }
 0x11c   : > { %5513 = vst [vmem:[#allocation14_spill] sm:$0xff] %v4561_v33  ;;  %v548_v28 = vmax.f32 %v488_v25, 0.0  ;;  %v491_v6 = vadd.f32 %v3336_v30, %v4358_v52  ;;  %v482_v37 = vpop.f32.mrb[23].mxu0  ;;  %3380 = vmatmul.mubr.f32.gmra.mrb[44].mxu0 %v876_v59  ;;  %3513 = vmatprep.mubr.f32.mxu1 %v4565_v23  ;;  %v4575_v35 = vsub.f32 %v625_v31, %v4561_v33  ;;  %v5461_v24 = vand.u32 4294901760, %v4565_v23 }
 0x11d   : > { %v546_v54 = vmax.f32 %v480_v15, 0.0  ;;  %v483_v34 = vadd.f32 %v4358_v52, %v482_v37  ;;  %3382 = vmatprep.mubr.f32.mxu0 %v886_v1  ;;  %v925_v1 = vsub.f32 %v4556_v39, %v5464_v21  ;;  %v5519_v21 = vand.u32 4294901760, %v4569_v42 }
 0x11e   : > { %5514 = vst [vmem:[#allocation15_spill] sm:$0xff] %v4575_v35  ;;  %v640_v25 = vsel %vm316_vm0, %v548_v28, 0  ;;  %v549_v36 = vmax.f32 %v491_v6, 0.0  ;;  %3514 = vmatmul.mubr.f32.vlgmr.msra.gmra.mrb[0].mxu1 %v4575_v35  ;;  %v905_v30 = vsub.f32 %v4565_v23, %v5461_v24  ;;  %v5467_v31 = vand.u32 4294901760, %v4575_v35 }
 0x11f   : > { %v4586_v59 = vand.u32 4294901760, %v640_v25  ;;  %v634_v15 = vsel %vm316_vm0, %v546_v54, 0  ;;  %v547_v37 = vmax.f32 %v483_v34, 0.0  ;;  %3780 = vmatpush3.bf16.msra.mxu1 %v4287_v56  ;;  %3516 = vmatprep.mubr.f32.mxu1 %v4556_v39 }
 0x120   : > { %v4594_v6 = vand.u32 4294901760, %v634_v15  ;;  %v643_v48 = vsel %vm316_vm0, %v549_v36, 0  ;;  %3383 = vmatmul.mubr.f32.gmra.mrb[46].mxu0 %v896_v27  ;;  %v906_v28 = vand.u32 4294901760, %v905_v30  ;;  %v915_v24 = vsub.f32 %v4575_v35, %v5467_v31  ;;  %3782 = vmatprep.subr.bf16.mxu1 %v4297_v61 }
 0x121   : > { %5515 = vst [vmem:[#allocation16_spill] sm:$0xff] %v4586_v59  ;;  %v4601_v54 = vand.u32 4294901760, %v643_v48  ;;  %v637_v34 = vsel %vm316_vm0, %v547_v37, 0  ;;  %v3339_v46 = vpop.f32.mrb[24].mxu0  ;;  %v4605_v44 = vsub.f32 %v640_v25, %v4586_v59  ;;  %v935_v36 = vsub.f32 %v4569_v42, %v5519_v21 }
 0x122   : > { %5516 = vst [vmem:[#allocation17_spill] sm:$0xff] %v4594_v6  ;;  %v4610_v27 = vand.u32 4294901760, %v637_v34  ;;  %v504_v30 = vadd.f32 %v3339_v46, %v4358_v52  ;;  %v495_v33 = vpop.f32.mrb[25].mxu0  ;;  %3385 = vmatprep.mubr.f32.mxu0 %v906_v28  ;;  %3517 = vmatmul.mubr.f32.gmra.mrb[2].mxu1 %v4569_v42  ;;  %v916_v31 = vand.u32 4294901760, %v915_v24  ;;  %v4615_v41 = vsub.f32 %v634_v15, %v4594_v6 }
 0x123   : > { %5517 = vst [vmem:[#allocation18_spill] sm:$0xff] %v4601_v54  ;;  %5518 = vst [vmem:[#allocation19_spill] sm:$0xff] %v4605_v44  ;;  %v496_v37 = vadd.f32 %v4358_v52, %v495_v33  ;;  %v3340_v25 = vpop.f32.mrb[26].mxu0  ;;  %v926_v59 = vand.u32 4294901760, %v925_v1  ;;  %3784 = vmatpush3.bf16.msra.mxu1 %v4297_v61  ;;  %v4620_v21 = vsub.f32 %v643_v48, %v4601_v54  ;;  %v936_v48 = vand.u32 4294901760, %v935_v36 }
 0x124   : > { %5520 = vst [vmem:[#allocation20_spill] sm:$0xff] %v4610_v27  ;;  %v552_v46 = vmax.f32 %v504_v30, 0.0  ;;  %v507_v28 = vadd.f32 %v3340_v25, %v4358_v52  ;;  %v498_v35 = vpop.f32.mrb[27].mxu0  ;;  %3386 = vmatmul.mubr.f32.gmra.mrb[48].mxu0 %v916_v31  ;;  %3519 = vmatprep.mubr.f32.mxu1 %v4615_v41  ;;  %v4626_v24 = vsub.f32 %v637_v34, %v4610_v27  ;;  %v5474_v33 = vand.u32 4294901760, %v4615_v41 }
 0x125   : > { %v550_v15 = vmax.f32 %v496_v37, 0.0  ;;  %v499_v1 = vadd.f32 %v4358_v52, %v498_v35  ;;  %3388 = vmatprep.mubr.f32.mxu0 %v926_v59  ;;  %3786 = vmatprep.subr.bf16.mxu1 %v4307_v2  ;;  %v5523_v36 = vand.u32 4294901760, %v4605_v44 }
 0x126   : > { %5521 = vst [vmem:[#allocation21_spill] sm:$0xff] %v4626_v24  ;;  %v652_v25 = vsel %vm316_vm0, %v552_v46, 0  ;;  %v553_v39 = vmax.f32 %v507_v28, 0.0  ;;  %3520 = vmatmul.mubr.f32.gmra.mrb[4].mxu1 %v4626_v24  ;;  %v945_v31 = vsub.f32 %v4615_v41, %v5474_v33  ;;  %v5483_v34 = vand.u32 4294901760, %v4626_v24 }
 0x127   : > { %v4638_v37 = vand.u32 4294901760, %v652_v25  ;;  %v646_v35 = vsel %vm316_vm0, %v550_v15, 0  ;;  %v551_v59 = vmax.f32 %v499_v1, 0.0  ;;  %3522 = vmatprep.mubr.f32.mxu1 %v4605_v44  ;;  %v965_v46 = vsub.f32 %v4605_v44, %v5523_v36  ;;  %3788 = vmatpush3.bf16.msra.mxu1 %v4307_v2 }
 0x128   : > { %v4646_v28 = vand.u32 4294901760, %v646_v35  ;;  %v655_v30 = vsel %vm316_vm0, %v553_v39, 0  ;;  %3389 = vmatmul.mubr.f32.gmra.mrb[50].mxu0 %v936_v48  ;;  %v946_v33 = vand.u32 4294901760, %v945_v31  ;;  %v955_v61 = vsub.f32 %v4626_v24, %v5483_v34  ;;  %3790 = vmatprep.subr.bf16.mxu1 %v4317_v7 }
 0x129   : > { %5522 = vst [vmem:[#allocation22_spill] sm:$0xff] %v4638_v37  ;;  %v4653_v15 = vand.u32 4294901760, %v655_v30  ;;  %v649_v1 = vsel %vm316_vm0, %v551_v59, 0  ;;  %v3343_v54 = vpop.f32.mrb[28].mxu0  ;;  %v4657_v36 = vsub.f32 %v652_v25, %v4638_v37  ;;  %v5525_v2 = vand.u32 4294901760, %v4620_v21 }
 0x12a   : > { %v4662_v48 = vand.u32 4294901760, %v649_v1  ;;  %v520_v31 = vadd.f32 %v3343_v54, %v4358_v52  ;;  %v511_v27 = vpop.f32.mrb[29].mxu0  ;;  %3391 = vmatprep.mubr.f32.mxu0 %v946_v33  ;;  %3523 = vmatmul.mubr.f32.gmra.mrb[6].mxu1 %v4620_v21  ;;  %v956_v34 = vand.u32 4294901760, %v955_v61  ;;  %v4667_v6 = vsub.f32 %v646_v35, %v4646_v28 }
 0x12b   : > { %5524 = vst [vmem:[#allocation23_spill] sm:$0xff] %v4653_v15  ;;  %v975_v39 = vsub.f32 %v4620_v21, %v5525_v2  ;;  %v512_v59 = vadd.f32 %v4358_v52, %v511_v27  ;;  %v3344_v25 = vpop.f32.mrb[30].mxu0  ;;  %v966_v37 = vand.u32 4294901760, %v965_v46  ;;  %v4671_v44 = vsub.f32 %v655_v30, %v4653_v15  ;;  %3792 = vmatpush3.bf16.msra.mxu1 %v4317_v7 }
 0x12c   : > { %5526 = vst [vmem:[#allocation24_spill] sm:$0xff] %v4662_v48  ;;  %v556_v54 = vmax.f32 %v520_v31, 0.0  ;;  %v523_v33 = vadd.f32 %v3344_v25, %v4358_v52  ;;  %v514_v24 = vpop.f32.mrb[31].mxu0  ;;  %3392 = vmatmul.mubr.f32.gmra.mrb[52].mxu0 %v956_v34  ;;  %3525 = vmatprep.mubr.f32.mxu1 %v4667_v6  ;;  %v4678_v61 = vsub.f32 %v649_v1, %v4662_v48  ;;  %v5490_v27 = vand.u32 4294901760, %v4667_v6 }
 0x12d   : > { %v554_v35 = vmax.f32 %v512_v59, 0.0  ;;  %v515_v30 = vadd.f32 %v4358_v52, %v514_v24  ;;  %3394 = vmatprep.mubr.f32.mxu0 %v966_v37  ;;  %v976_v46 = vand.u32 4294901760, %v975_v39  ;;  %3794 = vmatprep.subr.bf16.mxu1 %v4345_v45  ;;  %v5527_v37 = vand.u32 4294901760, %v4657_v36 }
 0x12e   : > { %v664_v31 = vsel %vm316_vm0, %v556_v54, 0  ;;  %v557_v25 = vmax.f32 %v523_v33, 0.0  ;;  %3526 = vmatmul.mubr.f32.gmra.mrb[8].mxu1 %v4678_v61  ;;  %v985_v34 = vsub.f32 %v4667_v6, %v5490_v27  ;;  %v5495_v1 = vand.u32 4294901760, %v4678_v61 }
 0x12f   : > { %v4690_v59 = vand.u32 4294901760, %v664_v31  ;;  %v658_v52 = vsel %vm316_vm0, %v554_v35, 0  ;;  %v555_v24 = vmax.f32 %v515_v30, 0.0  ;;  %3528 = vmatprep.mubr.f32.mxu1 %v4657_v36  ;;  %v1005_v39 = vsub.f32 %v4657_v36, %v5527_v37 }
 0x130   : > { %v4697_v54 = vand.u32 4294901760, %v658_v52  ;;  %v667_v33 = vsel %vm316_vm0, %v557_v25, 0  ;;  %3395 = vmatmul.mubr.f32.gmra.mrb[54].mxu0 %v976_v46  ;;  %v986_v2 = vand.u32 4294901760, %v985_v34  ;;  %v995_v27 = vsub.f32 %v4678_v61, %v5495_v1 }
 0x131   : > { %v4703_v7 = vand.u32 4294901760, %v667_v33  ;;  %v661_v35 = vsel %vm316_vm0, %v555_v24, 0  ;;  %v4707_v30 = vsub.f32 %v664_v31, %v4690_v59  ;;  %v5529_v25 = vand.u32 4294901760, %v4671_v44 }
 0x132   : > { %v4709_v15 = vand.u32 4294901760, %v661_v35  ;;  %3397 = vmatprep.mubr.f32.mxu0 %v986_v2  ;;  %3529 = vmatmul.mubr.f32.gmra.mrb[10].mxu1 %v4671_v44  ;;  %v996_v37 = vand.u32 4294901760, %v995_v27  ;;  %v4713_v46 = vsub.f32 %v658_v52, %v4697_v54  ;;  %v1006_v1 = vand.u32 4294901760, %v1005_v39 }
 0x133   : > { %5528 = vst [vmem:[#allocation25_spill] sm:$0xff] %v4703_v7  ;;  %v1015_v34 = vsub.f32 %v4671_v44, %v5529_v25  ;;  %v4719_v48 = vsub.f32 %v667_v33, %v4703_v7  ;;  %v1044_v31 = vand.u32 4294901760, %v4707_v30 }
 0x134   : > { %3398 = vmatmul.mubr.f32.gmra.mrb[56].mxu0 %v996_v37  ;;  %3531 = vmatprep.mubr.f32.mxu1 %v4713_v46  ;;  %v4724_v2 = vsub.f32 %v661_v35, %v4709_v15  ;;  %v5498_v27 = vand.u32 4294901760, %v4713_v46 }
 0x135   : > { %3400 = vmatprep.mubr.f32.mxu0 %v1006_v1  ;;  %v1016_v52 = vand.u32 4294901760, %v1015_v34  ;;  %v1054_v33 = vand.u32 4294901760, %v4719_v48  ;;  %v1045_v35 = vsub.f32 %v4707_v30, %v1044_v31 }
 0x136   : > { %3532 = vmatmul.mubr.f32.gmra.mrb[12].mxu1 %v4724_v2  ;;  %v1025_v24 = vsub.f32 %v4713_v46, %v5498_v27  ;;  %v1034_v39 = vand.u32 4294901760, %v4724_v2  ;;  %v5530_v27 = vand.u32 4294901760, %v4378_v17 }
 0x137   : > { %3534 = vmatprep.mubr.f32.mxu1 %v4707_v30  ;;  %v1055_v34 = vsub.f32 %v4719_v48, %v1054_v33  ;;  %v1046_v7 = vand.u32 4294901760, %v1045_v35  ;;  %v5542_v35 = vand.u32 4294901760, %v4517_v3 }
 0x138   : > { %3401 = vmatmul.mubr.f32.gmra.mrb[58].mxu0 %v1016_v52  ;;  %v1026_v37 = vand.u32 4294901760, %v1025_v24  ;;  %v1035_v1 = vsub.f32 %v4724_v2, %v1034_v39  ;;  %v5531_v52 = vand.u32 4294901760, %v4389_v26 }
 0x139   : > { %v1056_v24 = vand.u32 4294901760, %v1055_v34  ;;  %v5545_v34 = vld [vmem:[#allocation6_spill] sm:$0xff] }
 0x13a   : > { %3403 = vmatprep.mubr.f32.mxu0 %v1026_v37  ;;  %3535 = vmatmul.mubr.f32.gmra.mrb[14].mxu1 %v4719_v48  ;;  %v1036_v25 = vand.u32 4294901760, %v1035_v1  ;;  %v5532_v37 = vand.u32 4294901760, %v4372_v11  ;;  %v5533_v1 = vand.u32 4294901760, %v4384_v22  ;;  %v5581_v48 = vld [vmem:[#allocation3_spill] sm:$0xff] }
 0x13b   : > { %3553 = vmatprep.mubr.f32.mxu1 %v5530_v27  ;;  %v5534_v27 = vand.u32 4294901760, %v4422_v63 }
 0x13c   : > { %3404 = vmatmul.mubr.f32.gmra.mrb[60].mxu0 %v1036_v25  ;;  %v5544_v25 = vand.u32 4294901760, %v4507_v58 }
 0x13d   : > { %3406 = vmatprep.mubr.f32.mxu0 %v1046_v7  ;;  %v5535_v7 = vand.u32 4294901760, %v4433_v20 }
 0x13e   : > { %3554 = vmatmul.mubr.f32.vlgmr.msra.gmra.mrb[16].mxu1 %v5531_v52 }
 0x13f   : > { %3796 = vmatpush3.bf16.msra.mxu1 %v4345_v45  ;;  %3556 = vmatprep.mubr.f32.mxu1 %v5532_v37  ;;  %v5536_v45 = vand.u32 4294901760, %v4413_v55  ;;  %v5549_v37 = vld [vmem:[#allocation8_spill] sm:$0xff] }
 0x140   : > { %3407 = vmatmul.mubr.f32.gmra.mrb[62].mxu0 %v1056_v24  ;;  %3798 = vmatprep.subr.bf16.mxu1 %v4349_v49  ;;  %v5548_v24 = vand.u32 4294901760, %v4565_v23  ;;  %v5558_v23 = vand.u32 4294901760, %v4615_v41  ;;  %v5568_v41 = vand.u32 4294901760, %v4667_v6  ;;  %v5575_v6 = vand.u32 4294901760, %v4713_v46 }
 0x141   : > { %3425 = vmatprep.mubr.f32.mxu0 %v4368_v8 }
 0x142   : > { %3557 = vmatmul.mubr.f32.gmra.mrb[18].mxu1 %v5533_v1  ;;  %v5550_v1 = vld [vmem:[#allocation5_spill] sm:$0xff] }
 0x143   : > { %3559 = vmatprep.mubr.f32.mxu1 %v5534_v27  ;;  %3800 = vmatpush3.bf16.msra.mxu1 %v4349_v49  ;;  %v5538_v49 = vand.u32 4294901760, %v4469_v9  ;;  %v5551_v27 = vld [vmem:[#allocation15_spill] sm:$0xff] }
 0x144   : > { %3426 = vmatmul.mubr.f32.vlgmr.msra.gmra.mrb[32].mxu0 %v4380_v18  ;;  %3802 = vmatprep.subr.bf16.mxu1 %v4351_v50 }
 0x145   : > { %3428 = vmatprep.mubr.f32.mxu0 %v4365_v4  ;;  %3764 = vmatpush3.bf16.msra.mxu0 %v4321_v10  ;;  %v5537_v10 = vand.u32 4294901760, %v4428_v5 }
 0x146   : > { %3560 = vmatmul.mubr.f32.gmra.mrb[20].mxu1 %v5535_v7  ;;  %3766 = vmatprep.subr.bf16.mxu0 %v4325_v13  ;;  %v5552_v7 = vand.u32 4294901760, %v5551_v27  ;;  %v5565_v27 = vld [vmem:[#allocation12_spill] sm:$0xff] }
 0x147   : > { %3562 = vmatprep.mubr.f32.mxu1 %v5536_v45  ;;  %3804 = vmatpush3.bf16.msra.mxu1 %v4351_v50  ;;  %v5540_v50 = vand.u32 4294901760, %v4459_v60  ;;  %v5553_v45 = vld [vmem:[#allocation13_spill] sm:$0xff] }
 0x148   : > { %3429 = vmatmul.mubr.f32.gmra.mrb[34].mxu0 %v4374_v12  ;;  %3806 = vmatprep.subr.bf16.mxu1 %v4353_v51 }
 0x149   : > { %3431 = vmatprep.mubr.f32.mxu0 %v4409_v47  ;;  %3768 = vmatpush3.bf16.msra.mxu0 %v4325_v13  ;;  %v5539_v13 = vand.u32 4294901760, %v4481_v38 }
 0x14a   : > { %3563 = vmatmul.mubr.f32.gmra.mrb[22].mxu1 %v5537_v10  ;;  %3770 = vmatprep.subr.bf16.mxu0 %v4329_v16  ;;  %v5554_v10 = vand.u32 4294901760, %v5553_v45  ;;  %v5569_v45 = vld [vmem:[#allocation20_spill] sm:$0xff] }
 0x14b   : > { %3565 = vmatprep.mubr.f32.mxu1 %v5538_v49  ;;  %3808 = vmatpush3.bf16.msra.mxu1 %v4353_v51  ;;  %v5541_v51 = vand.u32 4294901760, %v4476_v29  ;;  %v5555_v49 = vld [vmem:[#allocation7_spill] sm:$0xff] }
 0x14c   : > { %3432 = vmatmul.mubr.f32.gmra.mrb[36].mxu0 %v4424_v0  ;;  %3810 = vmatprep.subr.bf16.mxu1 %v4287_v56 }
 0x14d   : > { %3434 = vmatprep.mubr.f32.mxu0 %v4400_v40  ;;  %3772 = vmatpush3.bf16.msra.mxu0 %v4329_v16  ;;  %v5543_v16 = vand.u32 4294901760, %v4529_v32 }
 0x14e   : > { %3566 = vmatmul.mubr.f32.gmra.mrb[24].mxu1 %v5539_v13  ;;  %3774 = vmatprep.subr.bf16.mxu0 %v4333_v19  ;;  %v5556_v13 = vld [vmem:[#allocation11_spill] sm:$0xff] }
 0x14f   : > { %3568 = vmatprep.mubr.f32.mxu1 %v5540_v50  ;;  %v5557_v50 = vand.u32 4294901760, %v4569_v42  ;;  %v5567_v42 = vand.u32 4294901760, %v4620_v21  ;;  %v5574_v21 = vand.u32 4294901760, %v4671_v44  ;;  %v5579_v44 = vld [vmem:[#allocation25_spill] sm:$0xff] }
 0x150   : > { %3435 = vmatmul.mubr.f32.gmra.mrb[38].mxu0 %v4415_v57 }
 0x151   : > { %3437 = vmatprep.mubr.f32.mxu0 %v4452_v53  ;;  %3776 = vmatpush3.bf16.msra.mxu0 %v4333_v19  ;;  %v5546_v19 = vld [vmem:[#allocation9_spill] sm:$0xff] }
 0x152   : > { %3569 = vmatmul.mubr.f32.gmra.mrb[26].mxu1 %v5541_v51  ;;  %v5547_v52 = vand.u32 4294901760, %v5546_v19  ;;  %v5559_v51 = vld [vmem:[#allocation14_spill] sm:$0xff] }
 0x153   : > { %3571 = vmatprep.mubr.f32.mxu1 %v5542_v35  ;;  %v5560_v35 = vld [vmem:[#allocation10_spill] sm:$0xff] }
 0x154   : > { %3438 = vmatmul.mubr.f32.gmra.mrb[40].mxu0 %v4471_v14 }
 0x155   : > { %3440 = vmatprep.mubr.f32.mxu0 %v4446_v43 }
 0x156   : > { %3572 = vmatmul.mubr.f32.gmra.mrb[28].mxu1 %v5543_v16  ;;  %v5561_v16 = vld [vmem:[#allocation21_spill] sm:$0xff] }
 0x157   : > { %3574 = vmatprep.mubr.f32.mxu1 %v5544_v25  ;;  %v5562_v25 = vand.u32 4294901760, %v5561_v16  ;;  %v5573_v16 = vld [vmem:[#allocation18_spill] sm:$0xff] }
 0x158   : > { %3441 = vmatmul.mubr.f32.gmra.mrb[42].mxu0 %v4461_v62 }
 0x159   : > { %3443 = vmatprep.mubr.f32.mxu0 %v5545_v34 }
 0x15a   : > { %3575 = vmatmul.mubr.f32.gmra.mrb[30].mxu1 %v5547_v52  ;;  %v5563_v52 = vld [vmem:[#allocation19_spill] sm:$0xff] }
 0x15b   : > { %3577 = vmatprep.mubr.f32.mxu1 %v5548_v24  ;;  %v5564_v24 = vand.u32 4294901760, %v5563_v52  ;;  %v5577_v52 = vld [vmem:[#allocation22_spill] sm:$0xff] }
 0x15c   : > { %3444 = vmatmul.mubr.f32.gmra.mrb[44].mxu0 %v5549_v37 }
 0x15d   : > { %3446 = vmatprep.mubr.f32.mxu0 %v5550_v1 }
 0x15e   : > { %3578 = vmatmul.mubr.f32.gmra.mrb[0].mxu1 %v5552_v7  ;;  %v5566_v7 = vld [vmem:[#allocation17_spill] sm:$0xff] }
 0x15f   : > { %3580 = vmatprep.mubr.f32.mxu1 %v5554_v10  ;;  %v5570_v10 = vld [vmem:[#allocation16_spill] sm:$0xff] }
 0x160   : > { %3447 = vmatmul.mubr.f32.gmra.mrb[46].mxu0 %v5555_v49 }
 0x161   : > { %3449 = vmatprep.mubr.f32.mxu0 %v5556_v13 }
 0x162   : > { %3581 = vmatmul.mubr.f32.gmra.mrb[2].mxu1 %v5557_v50  ;;  %v5571_v50 = vand.u32 4294901760, %v4678_v61  ;;  %v5580_v61 = vld [vmem:[#allocation2_spill] sm:$0xff] }
 0x163   : > { %3583 = vmatprep.mubr.f32.mxu1 %v5558_v23  ;;  %v5572_v23 = vand.u32 4294901760, %v4657_v36  ;;  %v5578_v36 = vld [vmem:[#allocation23_spill] sm:$0xff] }
 0x164   : > { %3450 = vmatmul.mubr.f32.gmra.mrb[48].mxu0 %v5559_v51 }
 0x165   : > { %3452 = vmatprep.mubr.f32.mxu0 %v5560_v35 }
 0x166   : > { %3584 = vmatmul.mubr.f32.gmra.mrb[4].mxu1 %v5562_v25  ;;  %v5576_v25 = vld [vmem:[#allocation24_spill] sm:$0xff] }
 0x167   : > { %3586 = vmatprep.mubr.f32.mxu1 %v5564_v24 }
 0x168   : > { %3453 = vmatmul.mubr.f32.gmra.mrb[50].mxu0 %v5565_v27 }
 0x169   : > { %3455 = vmatprep.mubr.f32.mxu0 %v5566_v7 }
 0x16a   : > { %3587 = vmatmul.mubr.f32.gmra.mrb[6].mxu1 %v5567_v42 }
 0x16b   : > { %3589 = vmatprep.mubr.f32.mxu1 %v5568_v41 }
 0x16c   : > { %3456 = vmatmul.mubr.f32.gmra.mrb[52].mxu0 %v5569_v45 }
 0x16d   : > { %3458 = vmatprep.mubr.f32.mxu0 %v5570_v10 }
 0x16e   : > { %3590 = vmatmul.mubr.f32.gmra.mrb[8].mxu1 %v5571_v50 }
 0x16f   : > { %3592 = vmatprep.mubr.f32.mxu1 %v5572_v23 }
 0x170   : > { %3459 = vmatmul.mubr.f32.gmra.mrb[54].mxu0 %v5573_v16 }
 0x171   : > { %3461 = vmatprep.mubr.f32.mxu0 %v4646_v28 }
 0x172   : > { %3593 = vmatmul.mubr.f32.gmra.mrb[10].mxu1 %v5574_v21 }
 0x173   : > { %3595 = vmatprep.mubr.f32.mxu1 %v5575_v6 }
 0x174   : > { %3462 = vmatmul.mubr.f32.gmra.mrb[56].mxu0 %v5576_v25 }
 0x175   : > { %3464 = vmatprep.mubr.f32.mxu0 %v5577_v52 }
 0x176   : > { %3596 = vmatmul.mubr.f32.gmra.mrb[12].mxu1 %v1034_v39 }
 0x177   : > { %3598 = vmatprep.mubr.f32.mxu1 %v1044_v31 }
 0x178   : > { %3465 = vmatmul.mubr.f32.gmra.mrb[58].mxu0 %v5578_v36 }
 0x179   : > { %3467 = vmatprep.mubr.f32.mxu0 %v4697_v54 }
 0x17a   : > { %3599 = vmatmul.mubr.f32.gmra.mrb[14].mxu1 %v1054_v33 }
 0x17b   : > { %3617 = vmatprep.mubr.f32.mxu1 %v4368_v8 }
 0x17c   : > { %3468 = vmatmul.mubr.f32.gmra.mrb[60].mxu0 %v4709_v15 }
 0x17d   : > { %3470 = vmatprep.mubr.f32.mxu0 %v4690_v59 }
 0x17e   : > { %3618 = vmatmul.mubr.f32.vlgmr.msra.gmra.mrb[16].mxu1 %v4380_v18 }
 0x17f   : > { %3812 = vmatpush3.bf16.msra.mxu1 %v4287_v56  ;;  %3620 = vmatprep.mubr.f32.mxu1 %v4365_v4  ;;  %v5582_v56 = vld [vmem:[#allocation4_spill] sm:$0xff] }
 0x180   : > { %3471 = vmatmul.mubr.f32.gmra.mrb[62].mxu0 %v5579_v44  ;;  %3814 = vmatprep.subr.bf16.mxu1 %v5580_v61 }
 0x181   : > { %3489 = vmatprep.mubr.f32.mxu0 %v4378_v17 }
 0x182   : > { %3621 = vmatmul.mubr.f32.gmra.mrb[18].mxu1 %v4374_v12 }
 0x183   : > { %3623 = vmatprep.mubr.f32.mxu1 %v4409_v47  ;;  %3816 = vmatpush3.bf16.msra.mxu1 %v5580_v61 }
 0x184   : > { %3490 = vmatmul.mubr.f32.vlgmr.msra.gmra.mrb[32].mxu0 %v4389_v26  ;;  %3818 = vmatprep.subr.bf16.mxu1 %v5581_v48 }
 0x185   : > { %3492 = vmatprep.mubr.f32.mxu0 %v4372_v11 }
 0x186   : > { %3624 = vmatmul.mubr.f32.gmra.mrb[20].mxu1 %v4424_v0 }
 0x187   : > { %3626 = vmatprep.mubr.f32.mxu1 %v4400_v40  ;;  %3820 = vmatpush3.bf16.msra.mxu1 %v5581_v48 }
 0x188   : > { %3493 = vmatmul.mubr.f32.gmra.mrb[34].mxu0 %v4384_v22  ;;  %3822 = vmatprep.subr.bf16.mxu1 %v5582_v56 }
 0x189   : > { %3495 = vmatprep.mubr.f32.mxu0 %v4422_v63 }
 0x18a   : > { %3627 = vmatmul.mubr.f32.gmra.mrb[22].mxu1 %v4415_v57 }
 0x18b   : > { %3629 = vmatprep.mubr.f32.mxu1 %v4452_v53  ;;  %3824 = vmatpush3.bf16.msra.mxu1 %v5582_v56 }
 0x18c   : > { %3496 = vmatmul.mubr.f32.gmra.mrb[36].mxu0 %v4433_v20 }
 0x18d   : > { %3498 = vmatprep.mubr.f32.mxu0 %v4413_v55 }
 0x18e   : > { %3630 = vmatmul.mubr.f32.gmra.mrb[24].mxu1 %v4471_v14 }
 0x18f   : > { %3632 = vmatprep.mubr.f32.mxu1 %v4446_v43 }
 0x190   : > { %3499 = vmatmul.mubr.f32.gmra.mrb[38].mxu0 %v4428_v5  ;;  %v4973_v5 = vld [vmem:[%s5431_s4] ss:$0 sm:$0xff] }
 0x191   : > { %3501 = vmatprep.mubr.f32.mxu0 %v4469_v9 }
 0x192   : > { %3633 = vmatmul.mubr.f32.gmra.mrb[26].mxu1 %v4461_v62 }
 0x193   : > { %3635 = vmatprep.mubr.f32.mxu1 %v5545_v34 }
 0x194   : > { %3502 = vmatmul.mubr.f32.gmra.mrb[40].mxu0 %v4481_v38 }
 0x195   : > { %3504 = vmatprep.mubr.f32.mxu0 %v4459_v60 }
 0x196   : > { %3636 = vmatmul.mubr.f32.gmra.mrb[28].mxu1 %v5549_v37 }
 0x197   : > { %3638 = vmatprep.mubr.f32.mxu1 %v5550_v1 }
 0x198   : > { %3505 = vmatmul.mubr.f32.gmra.mrb[42].mxu0 %v4476_v29 }
 0x199   : > { %3507 = vmatprep.mubr.f32.mxu0 %v4517_v3 }
 0x19a   : > { %3639 = vmatmul.mubr.f32.gmra.mrb[30].mxu1 %v5555_v49 }
 0x19b   : > { %3641 = vmatprep.mubr.f32.mxu1 %v5556_v13 }
 0x19c   : > { %3508 = vmatmul.mubr.f32.gmra.mrb[44].mxu0 %v4529_v32 }
 0x19d   : > { %3510 = vmatprep.mubr.f32.mxu0 %v4507_v58 }
 0x19e   : > { %3642 = vmatmul.mubr.f32.gmra.mrb[0].mxu1 %v5559_v51 }
 0x19f   : > { %3644 = vmatprep.mubr.f32.mxu1 %v5560_v35 }
 0x1a0   : > { %3511 = vmatmul.mubr.f32.gmra.mrb[46].mxu0 %v5546_v19 }
 0x1a2   : > { %3645 = vmatmul.mubr.f32.gmra.mrb[2].mxu1 %v5565_v27 }
 0x1a3   : > { %3647 = vmatprep.mubr.f32.mxu1 %v5566_v7 }
 0x1a6   : > { %3648 = vmatmul.mubr.f32.gmra.mrb[4].mxu1 %v5569_v45 }
 0x1a7   : > { %3650 = vmatprep.mubr.f32.mxu1 %v5570_v10 }
 0x1aa   : > { %3651 = vmatmul.mubr.f32.gmra.mrb[6].mxu1 %v5573_v16 }
 0x1ab   : > { %3653 = vmatprep.mubr.f32.mxu1 %v4646_v28 }
 0x1ae   : > { %3654 = vmatmul.mubr.f32.gmra.mrb[8].mxu1 %v5576_v25 }
 0x1af   : > { %3656 = vmatprep.mubr.f32.mxu1 %v5577_v52 }
 0x1b2   : > { %3657 = vmatmul.mubr.f32.gmra.mrb[10].mxu1 %v5578_v36 }
 0x1b3   : > { %3659 = vmatprep.mubr.f32.mxu1 %v4697_v54 }
 0x1b6   : > { %3660 = vmatmul.mubr.f32.gmra.mrb[12].mxu1 %v4709_v15 }
 0x1b7   : > { %3662 = vmatprep.mubr.f32.mxu1 %v4690_v59 }
 0x1ba   : > { %3663 = vmatmul.mubr.f32.gmra.mrb[14].mxu1 %v5579_v44 }
 0x1bb   : > { %3681 = vmatprep.mubr.f32.mxu1 %v4368_v8 }
 0x1be   : > { %3682 = vmatmul.mubr.f32.vlgmr.msra.gmra.mrb[16].mxu1 %v4380_v18 }
 0x1bf   : > { %3684 = vmatprep.mubr.f32.mxu1 %v4365_v4 }
 0x1c2   : > { %3685 = vmatmul.mubr.f32.gmra.mrb[18].mxu1 %v4374_v12 }
 0x1c3   : > { %3687 = vmatprep.mubr.f32.mxu1 %v4409_v47 }
 0x1c6   : > { %3688 = vmatmul.mubr.f32.gmra.mrb[20].mxu1 %v4424_v0 }
 0x1c7   : > { %3690 = vmatprep.mubr.f32.mxu1 %v4400_v40 }
 0x1ca   : > { %3691 = vmatmul.mubr.f32.gmra.mrb[22].mxu1 %v4415_v57 }
 0x1cb   : > { %3693 = vmatprep.mubr.f32.mxu1 %v4452_v53 }
 0x1ce   : > { %3694 = vmatmul.mubr.f32.gmra.mrb[24].mxu1 %v4471_v14 }
 0x1cf   : > { %3696 = vmatprep.mubr.f32.mxu1 %v4446_v43 }
 0x1d2   : > { %3697 = vmatmul.mubr.f32.gmra.mrb[26].mxu1 %v4461_v62 }
 0x1d3   : > { %3699 = vmatprep.mubr.f32.mxu1 %v5545_v34 }
 0x1d6   : > { %3700 = vmatmul.mubr.f32.gmra.mrb[28].mxu1 %v5549_v37 }
 0x1d7   : > { %3702 = vmatprep.mubr.f32.mxu1 %v5550_v1 }
 0x1da   : > { %3703 = vmatmul.mubr.f32.gmra.mrb[30].mxu1 %v5555_v49 }
 0x1db   : > { %3705 = vmatprep.mubr.f32.mxu1 %v5556_v13 }
 0x1de   : > { %3706 = vmatmul.mubr.f32.gmra.mrb[0].mxu1 %v5559_v51 }
 0x1df   : > { %3708 = vmatprep.mubr.f32.mxu1 %v5560_v35 }
 0x1e2   : > { %3709 = vmatmul.mubr.f32.gmra.mrb[2].mxu1 %v5565_v27 }
 0x1e3   : > { %3711 = vmatprep.mubr.f32.mxu1 %v5566_v7 }
 0x1e6   : > { %3712 = vmatmul.mubr.f32.gmra.mrb[4].mxu1 %v5569_v45 }
 0x1e7   : > { %3714 = vmatprep.mubr.f32.mxu1 %v5570_v10 }
 0x1ea   : > { %3715 = vmatmul.mubr.f32.gmra.mrb[6].mxu1 %v5573_v16 }
 0x1eb   : > { %3717 = vmatprep.mubr.f32.mxu1 %v4646_v28 }
 0x1ee   : > { %3718 = vmatmul.mubr.f32.gmra.mrb[8].mxu1 %v5576_v25 }
 0x1ef   : > { %3720 = vmatprep.mubr.f32.mxu1 %v5577_v52 }
 0x1f2   : > { %3721 = vmatmul.mubr.f32.gmra.mrb[10].mxu1 %v5578_v36 }
 0x1f3   : > { %3723 = vmatprep.mubr.f32.mxu1 %v4697_v54 }
 0x1f6   : > { %3724 = vmatmul.mubr.f32.gmra.mrb[12].mxu1 %v4709_v15 }
 0x1f7   : > { %3726 = vmatprep.mubr.f32.mxu1 %v4690_v59 }
 0x1fa   : > { %3727 = vmatmul.mubr.f32.gmra.mrb[14].mxu1 %v5579_v44 }
 0x237   : > { %v4942_v4 = vpop.f32.mrb[48].mxu0 }
 0x238   : > { %v4944_v8 = vpop.f32.mrb[49].mxu0 }
 0x23b   : > { %v4946_v11 = vpop.f32.mrb[50].mxu0 }
 0x23c   : > { %v4948_v12 = vpop.f32.mrb[51].mxu0 }
 0x23f   : > { %v4950_v17 = vpop.f32.mrb[52].mxu0 }
 0x240   : > { %v4952_v18 = vpop.f32.mrb[53].mxu0 }
 0x243   : > { %v4954_v22 = vpop.f32.mrb[54].mxu0 }
 0x244   : > { %v4956_v26 = vpop.f32.mrb[55].mxu0 }
 0x247   : > { %v4958_v40 = vpop.f32.mrb[56].mxu0 }
 0x248   : > { %v4960_v47 = vpop.f32.mrb[57].mxu0 }
 0x24b   : > { %v4962_v55 = vpop.f32.mrb[58].mxu0 }
 0x24c   : > { %v4964_v57 = vpop.f32.mrb[59].mxu0 }
 0x24f   : > { %v4966_v63 = vpop.f32.mrb[60].mxu0 }
 0x250   : > { %v4968_v0 = vpop.f32.mrb[61].mxu0 }
 0x253   : > { %v3472_v20 = vpop.f32.mrb[62].mxu0 }
 0x254   : > { %v4976_v43 = vadd.f32 %v3472_v20, %v4973_v5  ;;  %v4978_v53 = vpop.f32.mrb[63].mxu0 }
 0x257   : > { %v3491_v60 = vpop.f32.mrb[32].mxu0 }
 0x258   : > { %v1443_v62 = vpop.f32.mrb[33].mxu0  ;;  %v3833_v2 = vadd.f32 %v3491_v60, %v4973_v5 }
 0x259   : > { %v3835_v39 = vadd.f32 %v4973_v5, %v1443_v62 }
 0x25b   : > { %v3494_v9 = vpop.f32.mrb[34].mxu0 }
 0x25c   : > { %v1457_v14 = vpop.f32.mrb[35].mxu0  ;;  %v3837_v1 = vadd.f32 %v3494_v9, %v4973_v5 }
 0x25d   : > { %v3839_v13 = vadd.f32 %v4973_v5, %v1457_v14 }
 0x25f   : > { %v3497_v29 = vpop.f32.mrb[36].mxu0 }
 0x260   : > { %v1471_v38 = vpop.f32.mrb[37].mxu0  ;;  %v3841_v7 = vadd.f32 %v3497_v29, %v4973_v5 }
 0x261   : > { %v3843_v45 = vadd.f32 %v4973_v5, %v1471_v38 }
 0x263   : > { %v3500_v58 = vpop.f32.mrb[38].mxu0 }
 0x264   : > { %v1485_v3 = vpop.f32.mrb[39].mxu0  ;;  %v3845_v21 = vadd.f32 %v3500_v58, %v4973_v5 }
 0x265   : > { %v3847_v25 = vadd.f32 %v4973_v5, %v1485_v3 }
 0x267   : > { %v3503_v32 = vpop.f32.mrb[40].mxu0 }
 0x268   : > { %v1499_v28 = vpop.f32.mrb[41].mxu0  ;;  %v3849_v56 = vadd.f32 %v3503_v32, %v4973_v5 }
 0x269   : > { %v3851_v60 = vadd.f32 %v4973_v5, %v1499_v28 }
 0x26b   : > { %v3506_v15 = vpop.f32.mrb[42].mxu0 }
 0x26c   : > { %v1513_v59 = vpop.f32.mrb[43].mxu0  ;;  %v3853_v58 = vadd.f32 %v3506_v15, %v4973_v5 }
 0x26d   : > { %v3855_v32 = vadd.f32 %v4973_v5, %v1513_v59 }
 0x26f   : > { %v3509_v54 = vpop.f32.mrb[44].mxu0 }
 0x270   : > { %v1527_v30 = vpop.f32.mrb[45].mxu0 }
 0x273   : > { %v4980_v46 = vpop.f32.mrb[46].mxu0 }
 0x274   : > { %v4982_v31 = vpop.f32.mrb[47].mxu0 }
 0x291   : > { %v3683_v33 = vpop.f32.mrb[16].mxu1 }
 0x292   : > { %v4986_v34 = vadd.f32 %v3833_v2, %v3683_v33  ;;  %v2349_v19 = vpop.f32.mrb[17].mxu1 }
 0x293   : > { %v4988_v37 = vadd.f32 %v3835_v39, %v2349_v19 }
 0x294   : > { %v2543_v49 = vsel %vm2539_vm1, %v4986_v34, -inf }
 0x295   : > { %v3686_v51 = vpop.f32.mrb[18].mxu1  ;;  %2544 = vmax.xlane.f32.xlu0 %v2543_v49  ;;  %v2540_v42 = vsel %vm2539_vm1, %v4988_v37, -inf  ;;  %v3859_v49 = vadd.f32 %v4973_v5, %v1527_v30  ;;  %v3863_v30 = vadd.f32 %v4973_v5, %v4982_v31  ;;  %v3867_v31 = vadd.f32 %v4973_v5, %v4944_v8 }
 0x296   : > { %v4994_v35 = vadd.f32 %v3837_v1, %v3686_v51  ;;  %v2361_v24 = vpop.f32.mrb[19].mxu1  ;;  %v3857_v1 = vadd.f32 %v3509_v54, %v4973_v5  ;;  %v3871_v8 = vadd.f32 %v4973_v5, %v4948_v12  ;;  %v3875_v12 = vadd.f32 %v4973_v5, %v4952_v18 }
 0x297   : > { %v4996_v27 = vadd.f32 %v3839_v13, %v2361_v24  ;;  %v3879_v18 = vadd.f32 %v4973_v5, %v4956_v26  ;;  %v3883_v26 = vadd.f32 %v4973_v5, %v4960_v47  ;;  %v3887_v47 = vadd.f32 %v4973_v5, %v4964_v57 }
 0x298   : > { %v2549_v41 = vsel %vm2539_vm1, %v4994_v35, -inf  ;;  %v3891_v57 = vadd.f32 %v4973_v5, %v4968_v0 }
 0x299   : > { %v3689_v10 = vpop.f32.mrb[20].mxu1  ;;  %2541 = vmax.xlane.f32.xlu0 %v2540_v42  ;;  %2550 = vmax.xlane.f32.xlu1 %v2549_v41  ;;  %v2546_v6 = vsel %vm2539_vm1, %v4996_v27, -inf  ;;  %v3861_v42 = vadd.f32 %v4980_v46, %v4973_v5  ;;  %v3865_v46 = vadd.f32 %v4942_v4, %v4973_v5  ;;  %v3869_v4 = vadd.f32 %v4946_v11, %v4973_v5 }
 0x29a   : > { %v5004_v50 = vadd.f32 %v3841_v7, %v3689_v10  ;;  %v2373_v23 = vpop.f32.mrb[21].mxu1  ;;  %v3873_v11 = vadd.f32 %v4950_v17, %v4973_v5  ;;  %v3877_v17 = vadd.f32 %v4954_v22, %v4973_v5  ;;  %v3881_v22 = vadd.f32 %v4958_v40, %v4973_v5 }
 0x29b   : > { %v5006_v16 = vadd.f32 %v3843_v45, %v2373_v23  ;;  %v3885_v40 = vadd.f32 %v4962_v55, %v4973_v5  ;;  %v3889_v55 = vadd.f32 %v4966_v63, %v4973_v5 }
 0x29c   : > { %v2555_v20 = vsel %vm2539_vm1, %v5004_v50, -inf }
 0x29d   : > { %v3692_v52 = vpop.f32.mrb[22].mxu1  ;;  %2547 = vmax.xlane.f32.xlu1 %v2546_v6  ;;  %v2552_v36 = vsel %vm2539_vm1, %v5006_v16, -inf }
 0x29e   : > { %v5014_v44 = vadd.f32 %v3845_v21, %v3692_v52  ;;  %v2385_v61 = vpop.f32.mrb[23].mxu1  ;;  %2553 = vmax.xlane.f32.xlu0 %v2552_v36 }
 0x29f   : > { %v5016_v48 = vadd.f32 %v3847_v25, %v2385_v61 }
 0x2a0   : > { %v2561_v3 = vsel %vm2539_vm1, %v5014_v44, -inf }
 0x2a1   : > { %v3695_v62 = vpop.f32.mrb[24].mxu1  ;;  %2556 = vmax.xlane.f32.xlu1 %v2555_v20  ;;  %v2558_v9 = vsel %vm2539_vm1, %v5016_v48, -inf }
 0x2a2   : > { %v5024_v14 = vadd.f32 %v3849_v56, %v3695_v62  ;;  %v2397_v29 = vpop.f32.mrb[25].mxu1  ;;  %2559 = vmax.xlane.f32.xlu0 %v2558_v9 }
 0x2a3   : > { %v5026_v38 = vadd.f32 %v3851_v60, %v2397_v29 }
 0x2a4   : > { %v2567_v15 = vsel %vm2539_vm1, %v5024_v14, -inf }
 0x2a5   : > { %v3698_v2 = vpop.f32.mrb[26].mxu1  ;;  %2562 = vmax.xlane.f32.xlu1 %v2561_v3  ;;  %v2564_v28 = vsel %vm2539_vm1, %v5026_v38, -inf }
 0x2a6   : > { %v5034_v39 = vadd.f32 %v3853_v58, %v3698_v2  ;;  %v2409_v33 = vpop.f32.mrb[27].mxu1  ;;  %2565 = vmax.xlane.f32.xlu0 %v2564_v28 }
 0x2a7   : > { %v5036_v19 = vadd.f32 %v3855_v32, %v2409_v33 }
 0x2a8   : > { %v2573_v54 = vsel %vm2539_vm1, %v5034_v39, -inf }
 0x2a9   : > { %v3701_v13 = vpop.f32.mrb[28].mxu1  ;;  %2568 = vmax.xlane.f32.xlu1 %v2567_v15  ;;  %v2570_v59 = vsel %vm2539_vm1, %v5036_v19, -inf }
 0x2aa   : > { %v5044_v51 = vadd.f32 %v3857_v1, %v3701_v13  ;;  %v2421_v24 = vpop.f32.mrb[29].mxu1  ;;  %2571 = vmax.xlane.f32.xlu0 %v2570_v59 }
 0x2ab   : > { %v5046_v7 = vadd.f32 %v3859_v49, %v2421_v24 }
 0x2ac   : > { %v2579_v6 = vsel %vm2539_vm1, %v5044_v51, -inf }
 0x2ad   : > { %v3704_v41 = vpop.f32.mrb[30].mxu1  ;;  %2574 = vmax.xlane.f32.xlu1 %v2573_v54  ;;  %v2576_v45 = vsel %vm2539_vm1, %v5046_v7, -inf }
 0x2ae   : > { %v5056_v10 = vadd.f32 %v3861_v42, %v3704_v41  ;;  %v2433_v23 = vpop.f32.mrb[31].mxu1  ;;  %2577 = vmax.xlane.f32.xlu0 %v2576_v45 }
 0x2af   : > { %v5058_v21 = vadd.f32 %v3863_v30, %v2433_v23 }
 0x2b0   : > { %v2585_v20 = vsel %vm2539_vm1, %v5056_v10, -inf }
 0x2b1   : > { %v3707_v25 = vpop.f32.mrb[0].mxu1  ;;  %2580 = vmax.xlane.f32.xlu1 %v2579_v6  ;;  %v2582_v52 = vsel %vm2539_vm1, %v5058_v21, -inf }
 0x2b2   : > { %v5068_v36 = vadd.f32 %v3865_v46, %v3707_v25  ;;  %v2445_v61 = vpop.f32.mrb[1].mxu1  ;;  %2583 = vmax.xlane.f32.xlu0 %v2582_v52 }
 0x2b3   : > { %v5070_v56 = vadd.f32 %v3867_v31, %v2445_v61 }
 0x2b4   : > { %v2591_v3 = vsel %vm2539_vm1, %v5068_v36, -inf }
 0x2b5   : > { %v3710_v60 = vpop.f32.mrb[2].mxu1  ;;  %2586 = vmax.xlane.f32.xlu1 %v2585_v20  ;;  %v2588_v62 = vsel %vm2539_vm1, %v5070_v56, -inf }
 0x2b6   : > { %v5080_v9 = vadd.f32 %v3869_v4, %v3710_v60  ;;  %v2457_v29 = vpop.f32.mrb[3].mxu1  ;;  %2589 = vmax.xlane.f32.xlu0 %v2588_v62 }
 0x2b7   : > { %v5082_v58 = vadd.f32 %v3871_v8, %v2457_v29 }
 0x2b8   : > { %v2597_v15 = vsel %vm2539_vm1, %v5080_v9, -inf }
 0x2b9   : > { %v3713_v32 = vpop.f32.mrb[4].mxu1  ;;  %2592 = vmax.xlane.f32.xlu1 %v2591_v3  ;;  %v2594_v2 = vsel %vm2539_vm1, %v5082_v58, -inf  ;;  %v3895_v3 = vadd.f32 %v4973_v5, %v4978_v53 }
 0x2ba   : > { %v5092_v28 = vadd.f32 %v3873_v11, %v3713_v32  ;;  %v2469_v33 = vpop.f32.mrb[5].mxu1  ;;  %2595 = vmax.xlane.f32.xlu0 %v2594_v2 }
 0x2bb   : > { %v5094_v1 = vadd.f32 %v3875_v12, %v2469_v33 }
 0x2bc   : > { %v2603_v54 = vsel %vm2539_vm1, %v5092_v28, -inf }
 0x2bd   : > { %v3716_v49 = vpop.f32.mrb[6].mxu1  ;;  %2598 = vmax.xlane.f32.xlu1 %v2597_v15  ;;  %v2600_v13 = vsel %vm2539_vm1, %v5094_v1, -inf }
 0x2be   : > { %v5104_v59 = vadd.f32 %v3877_v17, %v3716_v49  ;;  %v2481_v24 = vpop.f32.mrb[7].mxu1  ;;  %2601 = vmax.xlane.f32.xlu0 %v2600_v13 }
 0x2bf   : > { %v5106_v42 = vadd.f32 %v3879_v18, %v2481_v24 }
 0x2c0   : > { %v2609_v6 = vsel %vm2539_vm1, %v5104_v59, -inf }
 0x2c1   : > { %v3719_v30 = vpop.f32.mrb[8].mxu1  ;;  %2604 = vmax.xlane.f32.xlu1 %v2603_v54  ;;  %v2606_v41 = vsel %vm2539_vm1, %v5106_v42, -inf }
 0x2c2   : > { %v5116_v45 = vadd.f32 %v3881_v22, %v3719_v30  ;;  %v2493_v23 = vpop.f32.mrb[9].mxu1  ;;  %2607 = vmax.xlane.f32.xlu0 %v2606_v41 }
 0x2c3   : > { %v5118_v46 = vadd.f32 %v3883_v26, %v2493_v23 }
 0x2c4   : > { %v2615_v20 = vsel %vm2539_vm1, %v5116_v45, -inf }
 0x2c5   : > { %v3722_v31 = vpop.f32.mrb[10].mxu1  ;;  %2610 = vmax.xlane.f32.xlu1 %v2609_v6  ;;  %v2612_v25 = vsel %vm2539_vm1, %v5118_v46, -inf }
 0x2c6   : > { %v5128_v52 = vadd.f32 %v3885_v40, %v3722_v31  ;;  %v2505_v61 = vpop.f32.mrb[11].mxu1  ;;  %2613 = vmax.xlane.f32.xlu0 %v2612_v25 }
 0x2c7   : > { %v5130_v4 = vadd.f32 %v3887_v47, %v2505_v61 }
 0x2c8   : > { %v2621_v63 = vsel %vm2539_vm1, %v5128_v52, -inf }
 0x2c9   : > { %v3725_v8 = vpop.f32.mrb[12].mxu1  ;;  %2616 = vmax.xlane.f32.xlu1 %v2615_v20  ;;  %v2618_v60 = vsel %vm2539_vm1, %v5130_v4, -inf }
 0x2ca   : > { %v5140_v62 = vadd.f32 %v3889_v55, %v3725_v8  ;;  %v2517_v29 = vpop.f32.mrb[13].mxu1  ;;  %2619 = vmax.xlane.f32.xlu0 %v2618_v60 }
 0x2cb   : > { %v5142_v11 = vadd.f32 %v3891_v57, %v2517_v29 }
 0x2cc   : > { %v2627_v17 = vsel %vm2539_vm1, %v5140_v62, -inf }
 0x2cd   : > { %v3728_v12 = vpop.f32.mrb[14].mxu1  ;;  %2622 = vmax.xlane.f32.xlu1 %v2621_v63  ;;  %v2624_v0 = vsel %vm2539_vm1, %v5142_v11, -inf }
 0x2ce   : > { %v5151_v32 = vadd.f32 %v4976_v43, %v3728_v12  ;;  %v2529_v2 = vpop.f32.mrb[15].mxu1  ;;  %2625 = vmax.xlane.f32.xlu0 %v2624_v0 }
 0x2cf   : > { %v5153_v33 = vadd.f32 %v3895_v3, %v2529_v2 }
 0x2d0   : > { %v2633_v5 = vsel %vm2539_vm1, %v5151_v32, -inf }
 0x2d1   : > { %2628 = vmax.xlane.f32.xlu1 %v2627_v17  ;;  %v2630_v15 = vsel %vm2539_vm1, %v5153_v33, -inf }
 0x2d2   : > { %2631 = vmax.xlane.f32.xlu0 %v2630_v15 }
 0x2d5   : > { %2634 = vmax.xlane.f32.xlu1 %v2633_v5 }
 0x322   : > { %v2545_v53 = vpop.xlane.xlu0 %2544 }
 0x323   : > { %v5162_v43 = vsub.f32 %v4986_v34, %v2545_v53 }
 0x325   : > { %v2670_v18 = vmul.f32 1.442695, %v5162_v43 }
 0x326   : > { %v2542_v49 = vpop.xlane.xlu0 %2541  ;;  %v2551_v13 = vpop.xlane.xlu1 %2550 }
 0x327   : > { %4037 = vpow2.f32 %v2670_v18  ;;  %v5166_v24 = vsub.f32 %v4988_v37, %v2542_v49  ;;  %v5169_v22 = vsub.f32 %v4994_v35, %v2551_v13 }
 0x329   : > { %v2668_v54 = vmul.f32 1.442695, %v5166_v24  ;;  %v2674_v26 = vmul.f32 1.442695, %v5169_v22 }
 0x32a   : > { %v2548_v30 = vpop.xlane.xlu1 %2547 }
 0x32b   : > { %4039 = vpow2.f32 %v2668_v54  ;;  %v5174_v34 = vsub.f32 %v4996_v27, %v2548_v30  ;;  %v2554_v41 = vpop.xlane.xlu0 %2553 }
 0x32c   : > { %4041 = vpow2.f32 %v2674_v26  ;;  %v5177_v23 = vsub.f32 %v5006_v16, %v2554_v41 }
 0x32d   : > { %v2672_v37 = vmul.f32 1.442695, %v5174_v34 }
 0x32e   : > { %v2676_v40 = vmul.f32 1.442695, %v5177_v23  ;;  %v2557_v35 = vpop.xlane.xlu1 %2556 }
 0x32f   : > { %4043 = vpow2.f32 %v2672_v37  ;;  %v5182_v6 = vsub.f32 %v5004_v50, %v2557_v35  ;;  %v2560_v47 = vpop.xlane.xlu0 %2559 }
 0x330   : > { %v5185_v31 = vsub.f32 %v5016_v48, %v2560_v47  ;;  %4045 = vpow2.f32 %v2676_v40 }
 0x331   : > { %v4038_v27 = vpop.eup %4037  ;;  %v2678_v25 = vmul.f32 1.442695, %v5182_v6 }
 0x332   : > { %v2680_v16 = vmul.f32 1.442695, %v5185_v31  ;;  %v2563_v61 = vpop.xlane.xlu1 %2562  ;;  %v2735_v55 = vsel %vm2539_vm1, %v4038_v27, 0.0 }
 0x333   : > { %4047 = vpow2.f32 %v2678_v25  ;;  %v5191_v20 = vsub.f32 %v5014_v44, %v2563_v61  ;;  %v2566_v57 = vpop.xlane.xlu0 %2565  ;;  %2736 = vadd.xlane.f32.xlu1 %v2735_v55 }
 0x334   : > { %v5194_v50 = vsub.f32 %v5026_v38, %v2566_v57  ;;  %4049 = vpow2.f32 %v2680_v16 }
 0x335   : > { %v4040_v48 = vpop.eup %4039  ;;  %v2682_v8 = vmul.f32 1.442695, %v5191_v20 }
 0x336   : > { %v4042_v60 = vpop.eup %4041  ;;  %v2684_v29 = vmul.f32 1.442695, %v5194_v50  ;;  %v2569_v63 = vpop.xlane.xlu1 %2568  ;;  %v2732_v3 = vsel %vm2539_vm1, %v4040_v48, 0.0 }
 0x337   : > { %4051 = vpow2.f32 %v2682_v8  ;;  %v5200_v12 = vsub.f32 %v5024_v14, %v2569_v63  ;;  %v2572_v44 = vpop.xlane.xlu0 %2571  ;;  %v2741_v0 = vsel %vm2539_vm1, %v4042_v60, 0.0  ;;  %2733 = vadd.xlane.f32.xlu0 %v2732_v3 }
 0x338   : > { %v5204_v38 = vsub.f32 %v5036_v19, %v2572_v44  ;;  %2742 = vadd.xlane.f32.xlu1 %v2741_v0  ;;  %4053 = vpow2.f32 %v2684_v29 }
 0x339   : > { %v4044_v2 = vpop.eup %4043  ;;  %v2686_v17 = vmul.f32 1.442695, %v5200_v12 }
 0x33a   : > { %v2688_v15 = vmul.f32 1.442695, %v5204_v38  ;;  %v2575_v5 = vpop.xlane.xlu1 %2574  ;;  %v2738_v53 = vsel %vm2539_vm1, %v4044_v2, 0.0  ;;  %v4046_v18 = vpop.eup %4045 }
 0x33b   : > { %4055 = vpow2.f32 %v2686_v17  ;;  %v5210_v14 = vsub.f32 %v5034_v39, %v2575_v5  ;;  %v2578_v49 = vpop.xlane.xlu0 %2577  ;;  %2739 = vadd.xlane.f32.xlu0 %v2738_v53  ;;  %v2744_v37 = vsel %vm2539_vm1, %v4046_v18, 0.0 }
 0x33c   : > { %v5213_v19 = vsub.f32 %v5046_v7, %v2578_v49  ;;  %4057 = vpow2.f32 %v2688_v15 }
 0x33d   : > { %v4048_v13 = vpop.eup %4047  ;;  %v2690_v54 = vmul.f32 1.442695, %v5210_v14 }
 0x33e   : > { %v2692_v26 = vmul.f32 1.442695, %v5213_v19  ;;  %v2581_v30 = vpop.xlane.xlu1 %2580  ;;  %v2747_v41 = vsel %vm2539_vm1, %v4048_v13, 0.0  ;;  %v4050_v40 = vpop.eup %4049 }
 0x33f   : > { %4059 = vpow2.f32 %v2690_v54  ;;  %v5220_v39 = vsub.f32 %v5044_v51, %v2581_v30  ;;  %2748 = vadd.xlane.f32.xlu1 %v2747_v41  ;;  %2745 = vadd.xlane.f32.xlu0 %v2744_v37  ;;  %v2584_v7 = vpop.xlane.xlu0 %2583  ;;  %v2750_v55 = vsel %vm2539_vm1, %v4050_v40, 0.0 }
 0x340   : > { %v5223_v35 = vsub.f32 %v5058_v21, %v2584_v7  ;;  %4061 = vpow2.f32 %v2692_v26 }
 0x341   : > { %v4052_v47 = vpop.eup %4051  ;;  %v2694_v27 = vmul.f32 1.442695, %v5220_v39 }
 0x342   : > { %v2696_v25 = vmul.f32 1.442695, %v5223_v35  ;;  %v2587_v16 = vpop.xlane.xlu1 %2586  ;;  %v2753_v61 = vsel %vm2539_vm1, %v4052_v47, 0.0  ;;  %v4054_v57 = vpop.eup %4053 }
 0x343   : > { %4063 = vpow2.f32 %v2694_v27  ;;  %v5230_v51 = vsub.f32 %v5056_v10, %v2587_v16  ;;  %2754 = vadd.xlane.f32.xlu1 %v2753_v61  ;;  %2751 = vadd.xlane.f32.xlu0 %v2750_v55  ;;  %v2590_v21 = vpop.xlane.xlu0 %2589  ;;  %v2756_v44 = vsel %vm2539_vm1, %v4054_v57, 0.0 }
 0x344   : > { %v5233_v48 = vsub.f32 %v5070_v56, %v2590_v21  ;;  %4065 = vpow2.f32 %v2696_v25 }
 0x345   : > { %v4056_v8 = vpop.eup %4055  ;;  %v2698_v60 = vmul.f32 1.442695, %v5230_v51 }
 0x346   : > { %v2700_v29 = vmul.f32 1.442695, %v5233_v48  ;;  %v2593_v63 = vpop.xlane.xlu1 %2592  ;;  %v2759_v3 = vsel %vm2539_vm1, %v4056_v8, 0.0  ;;  %v4058_v0 = vpop.eup %4057 }
 0x347   : > { %4067 = vpow2.f32 %v2698_v60  ;;  %v5240_v10 = vsub.f32 %v5068_v36, %v2593_v63  ;;  %2760 = vadd.xlane.f32.xlu1 %v2759_v3  ;;  %2757 = vadd.xlane.f32.xlu0 %v2756_v44  ;;  %v2596_v56 = vpop.xlane.xlu0 %2595  ;;  %v2762_v49 = vsel %vm2539_vm1, %v4058_v0, 0.0 }
 0x348   : > { %v5243_v2 = vsub.f32 %v5082_v58, %v2596_v56  ;;  %4069 = vpow2.f32 %v2700_v29 }
 0x349   : > { %v4060_v17 = vpop.eup %4059  ;;  %v2702_v15 = vmul.f32 1.442695, %v5240_v10 }
 0x34a   : > { %v2704_v5 = vmul.f32 1.442695, %v5243_v2  ;;  %v2599_v53 = vpop.xlane.xlu1 %2598  ;;  %v2765_v18 = vsel %vm2539_vm1, %v4060_v17, 0.0  ;;  %v4062_v13 = vpop.eup %4061 }
 0x34b   : > { %4071 = vpow2.f32 %v2702_v15  ;;  %v5250_v36 = vsub.f32 %v5080_v9, %v2599_v53  ;;  %2766 = vadd.xlane.f32.xlu1 %v2765_v18  ;;  %2763 = vadd.xlane.f32.xlu0 %v2762_v49  ;;  %v2602_v58 = vpop.xlane.xlu0 %2601  ;;  %v2768_v7 = vsel %vm2539_vm1, %v4062_v13, 0.0 }
 0x34c   : > { %v5253_v54 = vsub.f32 %v5094_v1, %v2602_v58  ;;  %4073 = vpow2.f32 %v2704_v5 }
 0x34d   : > { %v4064_v26 = vpop.eup %4063  ;;  %v2706_v30 = vmul.f32 1.442695, %v5250_v36 }
 0x34e   : > { %v2708_v41 = vmul.f32 1.442695, %v5253_v54  ;;  %v2605_v37 = vpop.xlane.xlu1 %2604  ;;  %v2771_v40 = vsel %vm2539_vm1, %v4064_v26, 0.0  ;;  %v4066_v47 = vpop.eup %4065 }
 0x34f   : > { %4075 = vpow2.f32 %v2706_v30  ;;  %v5260_v9 = vsub.f32 %v5092_v28, %v2605_v37  ;;  %2772 = vadd.xlane.f32.xlu1 %v2771_v40  ;;  %2769 = vadd.xlane.f32.xlu0 %v2768_v7  ;;  %v2608_v1 = vpop.xlane.xlu0 %2607  ;;  %v2774_v21 = vsel %vm2539_vm1, %v4066_v47, 0.0 }
 0x350   : > { %v5263_v27 = vsub.f32 %v5106_v42, %v2608_v1  ;;  %4077 = vpow2.f32 %v2708_v41 }
 0x351   : > { %v4068_v25 = vpop.eup %4067  ;;  %v2710_v16 = vmul.f32 1.442695, %v5260_v9 }
 0x352   : > { %v2712_v61 = vmul.f32 1.442695, %v5263_v27  ;;  %v2611_v55 = vpop.xlane.xlu1 %2610  ;;  %v2777_v57 = vsel %vm2539_vm1, %v4068_v25, 0.0  ;;  %v4070_v8 = vpop.eup %4069 }
 0x353   : > { %4079 = vpow2.f32 %v2710_v16  ;;  %v5270_v28 = vsub.f32 %v5104_v59, %v2611_v55  ;;  %2778 = vadd.xlane.f32.xlu1 %v2777_v57  ;;  %2775 = vadd.xlane.f32.xlu0 %v2774_v21  ;;  %v2614_v42 = vpop.xlane.xlu0 %2613  ;;  %v2780_v56 = vsel %vm2539_vm1, %v4070_v8, 0.0 }
 0x354   : > { %v5273_v60 = vsub.f32 %v5118_v46, %v2614_v42  ;;  %4081 = vpow2.f32 %v2712_v61 }
 0x355   : > { %v4072_v29 = vpop.eup %4071  ;;  %v2714_v63 = vmul.f32 1.442695, %v5270_v28 }
 0x356   : > { %v2716_v3 = vmul.f32 1.442695, %v5273_v60  ;;  %v2617_v44 = vpop.xlane.xlu1 %2616  ;;  %v2783_v0 = vsel %vm2539_vm1, %v4072_v29, 0.0  ;;  %v4074_v17 = vpop.eup %4073 }
 0x357   : > { %4083 = vpow2.f32 %v2714_v63  ;;  %v5280_v59 = vsub.f32 %v5116_v45, %v2617_v44  ;;  %2784 = vadd.xlane.f32.xlu1 %v2783_v0  ;;  %2781 = vadd.xlane.f32.xlu0 %v2780_v56  ;;  %v2620_v46 = vpop.xlane.xlu0 %2619  ;;  %v2786_v58 = vsel %vm2539_vm1, %v4074_v17, 0.0 }
 0x358   : > { %v5283_v15 = vsub.f32 %v5130_v4, %v2620_v46  ;;  %4085 = vpow2.f32 %v2716_v3 }
 0x359   : > { %v4076_v5 = vpop.eup %4075  ;;  %v2718_v53 = vmul.f32 1.442695, %v5280_v59 }
 0x35a   : > { %v2720_v18 = vmul.f32 1.442695, %v5283_v15  ;;  %v2623_v49 = vpop.xlane.xlu1 %2622  ;;  %v2789_v13 = vsel %vm2539_vm1, %v4076_v5, 0.0  ;;  %v4078_v26 = vpop.eup %4077 }
 0x35b   : > { %4087 = vpow2.f32 %v2718_v53  ;;  %v5290_v45 = vsub.f32 %v5128_v52, %v2623_v49  ;;  %2790 = vadd.xlane.f32.xlu1 %v2789_v13  ;;  %2787 = vadd.xlane.f32.xlu0 %v2786_v58  ;;  %v2626_v4 = vpop.xlane.xlu0 %2625  ;;  %v2792_v1 = vsel %vm2539_vm1, %v4078_v26, 0.0 }
 0x35c   : > { %v5293_v30 = vsub.f32 %v5142_v11, %v2626_v4  ;;  %4089 = vpow2.f32 %v2720_v18 }
 0x35d   : > { %v4080_v41 = vpop.eup %4079  ;;  %v2722_v37 = vmul.f32 1.442695, %v5290_v45 }
 0x35e   : > { %v2724_v40 = vmul.f32 1.442695, %v5293_v30  ;;  %v2629_v7 = vpop.xlane.xlu1 %2628  ;;  %v2795_v47 = vsel %vm2539_vm1, %v4080_v41, 0.0  ;;  %v4082_v25 = vpop.eup %4081 }
 0x35f   : > { %4091 = vpow2.f32 %v2722_v37  ;;  %v5300_v52 = vsub.f32 %v5140_v62, %v2629_v7  ;;  %2796 = vadd.xlane.f32.xlu1 %v2795_v47  ;;  %2793 = vadd.xlane.f32.xlu0 %v2792_v1  ;;  %v2632_v11 = vpop.xlane.xlu0 %2631  ;;  %v2798_v42 = vsel %vm2539_vm1, %v4082_v25, 0.0 }
 0x360   : > { %v5303_v16 = vsub.f32 %v5153_v33, %v2632_v11  ;;  %4093 = vpow2.f32 %v2724_v40 }
 0x361   : > { %v4084_v61 = vpop.eup %4083  ;;  %v2726_v55 = vmul.f32 1.442695, %v5300_v52 }
 0x362   : > { %v2728_v57 = vmul.f32 1.442695, %v5303_v16  ;;  %v2635_v21 = vpop.xlane.xlu1 %2634  ;;  %v2801_v8 = vsel %vm2539_vm1, %v4084_v61, 0.0  ;;  %v4086_v29 = vpop.eup %4085 }
 0x363   : > { %4095 = vpow2.f32 %v2726_v55  ;;  %v5310_v62 = vsub.f32 %v5151_v32, %v2635_v21  ;;  %2802 = vadd.xlane.f32.xlu1 %v2801_v8  ;;  %2799 = vadd.xlane.f32.xlu0 %v2798_v42  ;;  %v2804_v44 = vsel %vm2539_vm1, %v4086_v29, 0.0 }
 0x364   : > { %4097 = vpow2.f32 %v2728_v57 }
 0x365   : > { %v4088_v33 = vpop.eup %4087  ;;  %v2730_v63 = vmul.f32 1.442695, %v5310_v62 }
 0x366   : > { %v2807_v3 = vsel %vm2539_vm1, %v4088_v33, 0.0  ;;  %v4090_v0 = vpop.eup %4089 }
 0x367   : > { %4099 = vpow2.f32 %v2730_v63  ;;  %2808 = vadd.xlane.f32.xlu1 %v2807_v3  ;;  %2805 = vadd.xlane.f32.xlu0 %v2804_v44  ;;  %v2810_v32 = vsel %vm2539_vm1, %v4090_v0, 0.0 }
 0x369   : > { %v4092_v56 = vpop.eup %4091 }
 0x36a   : > { %v2813_v17 = vsel %vm2539_vm1, %v4092_v56, 0.0  ;;  %v4094_v46 = vpop.eup %4093 }
 0x36b   : > { %2814 = vadd.xlane.f32.xlu1 %v2813_v17  ;;  %2811 = vadd.xlane.f32.xlu0 %v2810_v32  ;;  %v2816_v18 = vsel %vm2539_vm1, %v4094_v46, 0.0 }
 0x36d   : > { %v4096_v5 = vpop.eup %4095 }
 0x36e   : > { %v2819_v53 = vsel %vm2539_vm1, %v4096_v5, 0.0  ;;  %v4098_v49 = vpop.eup %4097 }
 0x36f   : > { %2820 = vadd.xlane.f32.xlu1 %v2819_v53  ;;  %2817 = vadd.xlane.f32.xlu0 %v2816_v18  ;;  %v2822_v26 = vsel %vm2539_vm1, %v4098_v49, 0.0 }
 0x371   : > { %v4100_v13 = vpop.eup %4099 }
 0x372   : > { %v2825_v58 = vsel %vm2539_vm1, %v4100_v13, 0.0 }
 0x373   : > { %2826 = vadd.xlane.f32.xlu1 %v2825_v58  ;;  %2823 = vadd.xlane.f32.xlu0 %v2822_v26 }
 0x3c0   : > { %v2737_v4 = vpop.xlane.xlu1 %2736 }
 0x3c1   : > { %4101 = vlog2.f32 %v2737_v4 }
 0x3c4   : > { %v2734_v41 = vpop.xlane.xlu0 %2733 }
 0x3c5   : > { %v2743_v37 = vpop.xlane.xlu1 %2742  ;;  %4103 = vlog2.f32 %v2734_v41 }
 0x3c6   : > { %4105 = vlog2.f32 %v2743_v37 }
 0x3c8   : > { %v2740_v40 = vpop.xlane.xlu0 %2739 }
 0x3c9   : > { %4107 = vlog2.f32 %v2740_v40 }
 0x3cb   : > { %v4102_v7 = vpop.eup %4101 }
 0x3cc   : > { %v2831_v47 = vmul.f32 0.6931472, %v4102_v7  ;;  %v2749_v1 = vpop.xlane.xlu1 %2748  ;;  %v2746_v25 = vpop.xlane.xlu0 %2745 }
 0x3cd   : > { %4109 = vlog2.f32 %v2749_v1 }
 0x3ce   : > { %v2893_v11 = vsub.f32 %v5162_v43, %v2831_v47  ;;  %4111 = vlog2.f32 %v2746_v25 }
 0x3cf   : > { %v4104_v61 = vpop.eup %4103 }
 0x3d0   : > { %v4106_v55 = vpop.eup %4105  ;;  %2925 = vst.msk [vmem:[%s5326_s8 + $0x8] sm:$0xff] %vm2539_vm1, %v2893_v11  ;;  %v2829_v57 = vmul.f32 0.6931472, %v4104_v61  ;;  %v2755_v21 = vpop.xlane.xlu1 %2754 }
 0x3d1   : > { %v2752_v8 = vpop.xlane.xlu0 %2751  ;;  %v2835_v42 = vmul.f32 0.6931472, %v4106_v55  ;;  %4113 = vlog2.f32 %v2755_v21 }
 0x3d2   : > { %v2892_v29 = vsub.f32 %v5166_v24, %v2829_v57  ;;  %4115 = vlog2.f32 %v2752_v8 }
 0x3d3   : > { %v4108_v33 = vpop.eup %4107  ;;  %v2895_v63 = vsub.f32 %v5169_v22, %v2835_v42 }
 0x3d4   : > { %2924 = vst.msk [vmem:[%s5326_s8] sm:$0xff] %vm2539_vm1, %v2892_v29  ;;  %v2833_v43 = vmul.f32 0.6931472, %v4108_v33  ;;  %v2761_v3 = vpop.xlane.xlu1 %2760 }
 0x3d5   : > { %v2758_v44 = vpop.xlane.xlu0 %2757  ;;  %2927 = vst.msk [vmem:[%s5326_s8 + $0x18] sm:$0xff] %vm2539_vm1, %v2895_v63  ;;  %4117 = vlog2.f32 %v2761_v3 }
 0x3d6   : > { %v2894_v0 = vsub.f32 %v5174_v34, %v2833_v43  ;;  %4119 = vlog2.f32 %v2758_v44 }
 0x3d7   : > { %v4110_v56 = vpop.eup %4109 }
 0x3d8   : > { %v4112_v17 = vpop.eup %4111  ;;  %2926 = vst.msk [vmem:[%s5326_s8 + $0x10] sm:$0xff] %vm2539_vm1, %v2894_v0  ;;  %v2839_v24 = vmul.f32 0.6931472, %v4110_v56  ;;  %v2767_v32 = vpop.xlane.xlu1 %2766 }
 0x3d9   : > { %v2764_v22 = vpop.xlane.xlu0 %2763  ;;  %v2837_v46 = vmul.f32 0.6931472, %v4112_v17  ;;  %4121 = vlog2.f32 %v2767_v32 }
 0x3da   : > { %v2897_v5 = vsub.f32 %v5182_v6, %v2839_v24  ;;  %4123 = vlog2.f32 %v2764_v22 }
 0x3db   : > { %v4114_v53 = vpop.eup %4113  ;;  %v2896_v18 = vsub.f32 %v5177_v23, %v2837_v46 }
 0x3dc   : > { %v4116_v49 = vpop.eup %4115  ;;  %2929 = vst.msk [vmem:[%s5326_s8 + $0x28] sm:$0xff] %vm2539_vm1, %v2897_v5  ;;  %v2843_v34 = vmul.f32 0.6931472, %v4114_v53  ;;  %v2773_v13 = vpop.xlane.xlu1 %2772 }
 0x3dd   : > { %v2770_v58 = vpop.xlane.xlu0 %2769  ;;  %2928 = vst.msk [vmem:[%s5326_s8 + $0x20] sm:$0xff] %vm2539_vm1, %v2896_v18  ;;  %v2841_v26 = vmul.f32 0.6931472, %v4116_v49  ;;  %4125 = vlog2.f32 %v2773_v13 }
 0x3de   : > { %v2899_v4 = vsub.f32 %v5191_v20, %v2843_v34  ;;  %4127 = vlog2.f32 %v2770_v58 }
 0x3df   : > { %v4118_v6 = vpop.eup %4117  ;;  %v2898_v41 = vsub.f32 %v5185_v31, %v2841_v26 }
 0x3e0   : > { %v4120_v37 = vpop.eup %4119  ;;  %2931 = vst.msk [vmem:[%s5326_s8 + $0x38] sm:$0xff] %vm2539_vm1, %v2899_v4  ;;  %v2847_v23 = vmul.f32 0.6931472, %v4118_v6  ;;  %v2779_v40 = vpop.xlane.xlu1 %2778 }
 0x3e1   : > { %v2776_v7 = vpop.xlane.xlu0 %2775  ;;  %2930 = vst.msk [vmem:[%s5326_s8 + $0x30] sm:$0xff] %vm2539_vm1, %v2898_v41  ;;  %v2845_v47 = vmul.f32 0.6931472, %v4120_v37  ;;  %4129 = vlog2.f32 %v2779_v40 }
 0x3e2   : > { %v2901_v1 = vsub.f32 %v5200_v12, %v2847_v23  ;;  %4131 = vlog2.f32 %v2776_v7 }
 0x3e3   : > { %v4122_v20 = vpop.eup %4121  ;;  %v2900_v25 = vsub.f32 %v5194_v50, %v2845_v47 }
 0x3e4   : > { %v4124_v11 = vpop.eup %4123  ;;  %2933 = vst.msk [vmem:[%s5326_s8 + $0x48] sm:$0xff] %vm2539_vm1, %v2901_v1  ;;  %v2851_v31 = vmul.f32 0.6931472, %v4122_v20  ;;  %v2785_v61 = vpop.xlane.xlu1 %2784 }
 0x3e5   : > { %v2782_v55 = vpop.xlane.xlu0 %2781  ;;  %2932 = vst.msk [vmem:[%s5326_s8 + $0x40] sm:$0xff] %vm2539_vm1, %v2900_v25  ;;  %v2849_v57 = vmul.f32 0.6931472, %v4124_v11  ;;  %4133 = vlog2.f32 %v2785_v61 }
 0x3e6   : > { %v2903_v21 = vsub.f32 %v5210_v14, %v2851_v31  ;;  %4135 = vlog2.f32 %v2782_v55 }
 0x3e7   : > { %v4126_v12 = vpop.eup %4125  ;;  %v2902_v8 = vsub.f32 %v5204_v38, %v2849_v57 }
 0x3e8   : > { %v4128_v42 = vpop.eup %4127  ;;  %2935 = vst.msk [vmem:[%s5326_s8 + $0x58] sm:$0xff] %vm2539_vm1, %v2903_v21  ;;  %v2855_v50 = vmul.f32 0.6931472, %v4126_v12  ;;  %v2791_v29 = vpop.xlane.xlu1 %2790 }
 0x3e9   : > { %v2788_v33 = vpop.xlane.xlu0 %2787  ;;  %2934 = vst.msk [vmem:[%s5326_s8 + $0x50] sm:$0xff] %vm2539_vm1, %v2902_v8  ;;  %v2853_v63 = vmul.f32 0.6931472, %v4128_v42  ;;  %4137 = vlog2.f32 %v2791_v29 }
 0x3ea   : > { %v2905_v43 = vsub.f32 %v5220_v39, %v2855_v50  ;;  %4139 = vlog2.f32 %v2788_v33 }
 0x3eb   : > { %v4130_v14 = vpop.eup %4129  ;;  %v2904_v3 = vsub.f32 %v5213_v19, %v2853_v63 }
 0x3ec   : > { %v4132_v44 = vpop.eup %4131  ;;  %2937 = vst.msk [vmem:[%s5326_s8 + $0x68] sm:$0xff] %vm2539_vm1, %v2905_v43  ;;  %v2859_v38 = vmul.f32 0.6931472, %v4130_v14  ;;  %v2797_v0 = vpop.xlane.xlu1 %2796 }
 0x3ed   : > { %v2794_v56 = vpop.xlane.xlu0 %2793  ;;  %2936 = vst.msk [vmem:[%s5326_s8 + $0x60] sm:$0xff] %vm2539_vm1, %v2904_v3  ;;  %v2857_v17 = vmul.f32 0.6931472, %v4132_v44  ;;  %4141 = vlog2.f32 %v2797_v0 }
 0x3ee   : > { %v2907_v24 = vsub.f32 %v5230_v51, %v2859_v38  ;;  %4143 = vlog2.f32 %v2794_v56 }
 0x3ef   : > { %v4134_v39 = vpop.eup %4133  ;;  %v2906_v32 = vsub.f32 %v5223_v35, %v2857_v17 }
 0x3f0   : > { %v4136_v22 = vpop.eup %4135  ;;  %2939 = vst.msk [vmem:[%s5326_s8 + $0x78] sm:$0xff] %vm2539_vm1, %v2907_v24  ;;  %v2863_v19 = vmul.f32 0.6931472, %v4134_v39  ;;  %v2803_v46 = vpop.xlane.xlu1 %2802 }
 0x3f1   : > { %v2800_v5 = vpop.xlane.xlu0 %2799  ;;  %2938 = vst.msk [vmem:[%s5326_s8 + $0x70] sm:$0xff] %vm2539_vm1, %v2906_v32  ;;  %v2861_v53 = vmul.f32 0.6931472, %v4136_v22  ;;  %4145 = vlog2.f32 %v2803_v46 }
 0x3f2   : > { %v2909_v18 = vsub.f32 %v5240_v10, %v2863_v19  ;;  %4147 = vlog2.f32 %v2800_v5 }
 0x3f3   : > { %v4138_v51 = vpop.eup %4137  ;;  %v2908_v49 = vsub.f32 %v5233_v48, %v2861_v53 }
 0x3f4   : > { %v4140_v34 = vpop.eup %4139  ;;  %2941 = vst.msk [vmem:[%s5326_s8 + $0x88] sm:$0xff] %vm2539_vm1, %v2909_v18  ;;  %v2867_v35 = vmul.f32 0.6931472, %v4138_v51  ;;  %v2809_v13 = vpop.xlane.xlu1 %2808 }
 0x3f5   : > { %v2806_v58 = vpop.xlane.xlu0 %2805  ;;  %2940 = vst.msk [vmem:[%s5326_s8 + $0x80] sm:$0xff] %vm2539_vm1, %v2908_v49  ;;  %v2865_v26 = vmul.f32 0.6931472, %v4140_v34  ;;  %4149 = vlog2.f32 %v2809_v13 }
 0x3f6   : > { %v2911_v4 = vsub.f32 %v5250_v36, %v2867_v35  ;;  %4151 = vlog2.f32 %v2806_v58 }
 0x3f7   : > { %v4142_v10 = vpop.eup %4141  ;;  %v2910_v6 = vsub.f32 %v5243_v2, %v2865_v26 }
 0x3f8   : > { %v4144_v41 = vpop.eup %4143  ;;  %2943 = vst.msk [vmem:[%s5326_s8 + $0x98] sm:$0xff] %vm2539_vm1, %v2911_v4  ;;  %v2871_v48 = vmul.f32 0.6931472, %v4142_v10  ;;  %v2815_v37 = vpop.xlane.xlu1 %2814 }
 0x3f9   : > { %v2812_v23 = vpop.xlane.xlu0 %2811  ;;  %2942 = vst.msk [vmem:[%s5326_s8 + $0x90] sm:$0xff] %vm2539_vm1, %v2910_v6  ;;  %v2869_v40 = vmul.f32 0.6931472, %v4144_v41  ;;  %4153 = vlog2.f32 %v2815_v37 }
 0x3fa   : > { %v2913_v7 = vsub.f32 %v5260_v9, %v2871_v48  ;;  %4155 = vlog2.f32 %v2812_v23 }
 0x3fb   : > { %v4146_v36 = vpop.eup %4145  ;;  %v2912_v47 = vsub.f32 %v5253_v54, %v2869_v40 }
 0x3fc   : > { %v4148_v1 = vpop.eup %4147  ;;  %2945 = vst.msk [vmem:[%s5326_s8 + $0xa8] sm:$0xff] %vm2539_vm1, %v2913_v7  ;;  %v2875_v2 = vmul.f32 0.6931472, %v4146_v36  ;;  %v2821_v20 = vpop.xlane.xlu1 %2820 }
 0x3fd   : > { %v2818_v25 = vpop.xlane.xlu0 %2817  ;;  %2944 = vst.msk [vmem:[%s5326_s8 + $0xa0] sm:$0xff] %vm2539_vm1, %v2912_v47  ;;  %v2873_v11 = vmul.f32 0.6931472, %v4148_v1  ;;  %4157 = vlog2.f32 %v2821_v20 }
 0x3fe   : > { %v2915_v31 = vsub.f32 %v5270_v28, %v2875_v2  ;;  %4159 = vlog2.f32 %v2818_v25 }
 0x3ff   : > { %v4150_v9 = vpop.eup %4149  ;;  %v2914_v61 = vsub.f32 %v5263_v27, %v2873_v11 }
 0x400   : > { %v4152_v54 = vpop.eup %4151  ;;  %2947 = vst.msk [vmem:[%s5326_s8 + $0xb8] sm:$0xff] %vm2539_vm1, %v2915_v31  ;;  %v2879_v55 = vmul.f32 0.6931472, %v4150_v9  ;;  %v2827_v57 = vpop.xlane.xlu1 %2826 }
 0x401   : > { %v2824_v21 = vpop.xlane.xlu0 %2823  ;;  %2946 = vst.msk [vmem:[%s5326_s8 + $0xb0] sm:$0xff] %vm2539_vm1, %v2914_v61  ;;  %v2877_v12 = vmul.f32 0.6931472, %v4152_v54  ;;  %4161 = vlog2.f32 %v2827_v57 }
 0x402   : > { %v2917_v28 = vsub.f32 %v5280_v59, %v2879_v55  ;;  %4163 = vlog2.f32 %v2824_v21 }
 0x403   : > { %v4154_v8 = vpop.eup %4153  ;;  %v2916_v42 = vsub.f32 %v5273_v60, %v2877_v12 }
 0x404   : > { %v4156_v27 = vpop.eup %4155  ;;  %2949 = vst.msk [vmem:[%s5326_s8 + $0xc8] sm:$0xff] %vm2539_vm1, %v2917_v28  ;;  %v2883_v50 = vmul.f32 0.6931472, %v4154_v8 }
 0x405   : > { %2948 = vst.msk [vmem:[%s5326_s8 + $0xc0] sm:$0xff] %vm2539_vm1, %v2916_v42  ;;  %v2881_v29 = vmul.f32 0.6931472, %v4156_v27 }
 0x406   : > { %v2919_v33 = vsub.f32 %v5290_v45, %v2883_v50 }
 0x407   : > { %v4158_v63 = vpop.eup %4157  ;;  %v2918_v43 = vsub.f32 %v5283_v15, %v2881_v29 }
 0x408   : > { %v4160_v59 = vpop.eup %4159  ;;  %2951 = vst.msk [vmem:[%s5326_s8 + $0xd8] sm:$0xff] %vm2539_vm1, %v2919_v33  ;;  %v2887_v60 = vmul.f32 0.6931472, %v4158_v63 }
 0x409   : > { %2950 = vst.msk [vmem:[%s5326_s8 + $0xd0] sm:$0xff] %vm2539_vm1, %v2918_v43  ;;  %v2885_v14 = vmul.f32 0.6931472, %v4160_v59 }
 0x40a   : > { %v2921_v3 = vsub.f32 %v5300_v52, %v2887_v60 }
 0x40b   : > { %v4162_v44 = vpop.eup %4161  ;;  %v2920_v38 = vsub.f32 %v5293_v30, %v2885_v14 }
 0x40c   : > { %v4164_v0 = vpop.eup %4163  ;;  %2953 = vst.msk [vmem:[%s5326_s8 + $0xe8] sm:$0xff] %vm2539_vm1, %v2921_v3  ;;  %v2891_v45 = vmul.f32 0.6931472, %v4162_v44 }
 0x40d   : > { %2952 = vst.msk [vmem:[%s5326_s8 + $0xe0] sm:$0xff] %vm2539_vm1, %v2920_v38  ;;  %v2889_v15 = vmul.f32 0.6931472, %v4164_v0 }
 0x40e   : > { %v2923_v56 = vsub.f32 %v5310_v62, %v2891_v45 }
 0x40f   : > { %v2922_v17 = vsub.f32 %v5303_v16, %v2889_v15 }
 0x410   : > { %2955 = vst.msk [vmem:[%s5326_s8 + $0xf8] sm:$0xff] %vm2539_vm1, %v2923_v56 }
 0x411   : > { %2954 = vst.msk [vmem:[%s5326_s8 + $0xf0] sm:$0xff] %vm2539_vm1, %v2922_v17 }
 0x412 PF: > { %s15_s18 = sadd.s32 1, %s4171_s18  }
 0x413   : > { %p12_p4 = scmp.ge.s32.totalorder %s15_s18, 4  }
 0x415   :  { %14 = sbr.rel (!%p12_p4) target bundleno = 1 (0x1), region = 70 }

</bundles_post_ra>
